<compile_context>
chip_gen: v6e
topology: v6e:2x2x1
jax: 0.10.0
libtpu: 0.0.40
codegen_flags: <defaults>
</compile_context>

<pallas_src>
import functools

import jax
import jax.numpy as jnp
from jax import lax
from jax.experimental import pallas as pl
from jax.experimental.pallas import tpu as pltpu


HP = 128   # padded hidden dim (one full 128-lane block per gate)
TP = 128   # padded tag dim (lane-dense output)


def lstm_tagger_kernel(ids_ref, xg_hbm, whh_ref, wout_ref, bout_ref,
                       out_ref, xg_scr, gather_sems, hs_scr):
    # ids_ref    : SMEM (seq,) int32              token ids (scalar-prefetched)
    # xg_hbm     : HBM  (vocab, 4*HP) f32         folded emb@W_ih^T + bias, gate-block padded
    # whh_ref    : VMEM (HP, 4*HP) bf16           recurrent weights, gate-block padded
    # wout_ref   : VMEM (HP, TP) bf16             output projection (zero-padded)
    # bout_ref   : VMEM (1, TP) f32               output bias (-1e9 on padded tag lanes)
    # out_ref    : VMEM (seq, TP) f32             log_softmax scores (padded lanes ~ -1e9)
    # xg_scr     : VMEM (seq, 4*HP) f32           gathered per-token gate rows
    # gather_sems: DMA semaphores (seq,)
    # hs_scr     : VMEM (seq, HP) f32             per-step hidden states
    seq = hs_scr.shape[0]

    # ---- Phase 1: issue ALL per-token row gathers up front (HBM -> VMEM scratch). ----
    @pl.loop(0, seq, unroll=True)
    def _(t):
        tid = ids_ref[t]
        pltpu.make_async_copy(
            xg_hbm.at[pl.ds(tid, 1), :],
            xg_scr.at[pl.ds(t, 1), :],
            gather_sems.at[t],
        ).start()

    # ---- Phase 2: serial LSTM recurrence (latency-bound). ----
    def step(t, carry):
        h, c = carry                                    # each (1, HP) f32
        # Wait only for this token's row (src slice is a dummy same-shape view;
        # wait() just consumes the per-row semaphore / byte count).
        pltpu.make_async_copy(
            xg_hbm.at[pl.ds(0, 1), :],
            xg_scr.at[pl.ds(t, 1), :],
            gather_sems.at[t],
        ).wait()
        gates = xg_scr[pl.ds(t, 1), :] + jnp.dot(
            h.astype(whh_ref.dtype), whh_ref[...],
            preferred_element_type=jnp.float32)         # (1, 4*HP) f32
        # Gate order i, f, g, o (PyTorch nn.LSTM); each slice is a full 128-lane block.
        # One fused sigmoid over the whole row (single EUP stream), tanh on g only.
        sg = jax.nn.sigmoid(gates)
        i = sg[:, 0 * HP:1 * HP]
        f = sg[:, 1 * HP:2 * HP]
        o = sg[:, 3 * HP:4 * HP]
        g = jnp.tanh(gates[:, 2 * HP:3 * HP])
        c = f * c + i * g
        h = o * jnp.tanh(c)
        hs_scr[pl.ds(t, 1), :] = h
        return (h, c)

    h0 = jnp.zeros((1, HP), jnp.float32)
    c0 = jnp.zeros((1, HP), jnp.float32)
    lax.fori_loop(0, seq, step, (h0, c0), unroll=min(seq, 8))

    # ---- Phase 3: output projection + log_softmax over (padded) tag lanes. ----
    # Padded tag columns carry a -1e9 bias, so exp(pad - m) == 0 and the LSE over
    # valid tags is exact.
    tag_space = jnp.dot(hs_scr[...].astype(wout_ref.dtype), wout_ref[...],
                        preferred_element_type=jnp.float32) + bout_ref[...]   # (seq, TP)
    m = jnp.max(tag_space, axis=1, keepdims=True)
    lse = m + jnp.log(jnp.sum(jnp.exp(tag_space - m), axis=1, keepdims=True))
    out_ref[...] = tag_space - lse


def prepare_params(params, mxu_dtype=jnp.bfloat16):
    """One-time parameter preparation (fold embedding, pad gate blocks, cast MXU weights)."""
    emb, w_ih, w_hh, b_ih, b_hh, w_out, b_out = params
    H = w_hh.shape[1]
    T = w_out.shape[0]

    # Fold embedding + both biases into a per-token gate table: (vocab, 4H), f32.
    xg = emb @ w_ih.T + (b_ih + b_hh)[None, :]

    def pad_gate_blocks(mat_4h, rows_out):
        # mat_4h: (rows, 4H) -> (rows_out, 4*HP), gate k at lanes [k*HP, k*HP+H), rest zero.
        rows = mat_4h.shape[0]
        out = jnp.zeros((rows_out, 4 * HP), jnp.float32)
        for k in range(4):
            out = out.at[:rows, k * HP:k * HP + H].set(mat_4h[:, k * H:(k + 1) * H])
        return out

    xg_p = pad_gate_blocks(xg, xg.shape[0])                          # (vocab, 4*HP) f32, HBM-resident
    whh_p = pad_gate_blocks(w_hh.T, HP).astype(mxu_dtype)            # (HP, 4*HP) bf16
    wout_p = (jnp.zeros((HP, TP), jnp.float32)
              .at[:H, :T].set(w_out.T).astype(mxu_dtype))            # (HP, TP) bf16
    bout_p = jnp.full((1, TP), -1e9, jnp.float32).at[0, :T].set(b_out)  # (1, TP) f32
    return (xg_p, whh_p, wout_p, bout_p), T


@functools.partial(jax.jit, static_argnums=(2,))
def lstm_tagger_forward(sentence, prepped, tagset_size):
    xg_p, whh_p, wout_p, bout_p = prepped
    seq = sentence.shape[0]
    ids = sentence.astype(jnp.int32)

    out_padded = pl.pallas_call(
        lstm_tagger_kernel,
        out_shape=jax.ShapeDtypeStruct((seq, TP), jnp.float32),
        grid_spec=pltpu.PrefetchScalarGridSpec(
            num_scalar_prefetch=1,
            grid=(1,),
            in_specs=[
                # Folded table stays in HBM; only `seq` rows are ever DMA'd.
                pl.BlockSpec(memory_space=pl.ANY),
                pl.BlockSpec(whh_p.shape, lambda i, ids: (0, 0)),
                pl.BlockSpec(wout_p.shape, lambda i, ids: (0, 0)),
                pl.BlockSpec(bout_p.shape, lambda i, ids: (0, 0)),
            ],
            out_specs=pl.BlockSpec((seq, TP), lambda i, ids: (0, 0)),
            scratch_shapes=[
                pltpu.VMEM((seq, 4 * HP), jnp.float32),   # gathered per-token gate rows
                pltpu.SemaphoreType.DMA((seq,)),          # one semaphore per gathered row
                pltpu.VMEM((seq, HP), jnp.float32),       # per-step hidden states
            ],
        ),
        compiler_params=pltpu.CompilerParams(
            dimension_semantics=("arbitrary",)),
    )(ids, xg_p, whh_p, wout_p, bout_p)

    return out_padded[:, :tagset_size]                    # drop padded tag lanes


def lstm_tagger_reference(sentence, params):
    """Pure-JAX f32 reference mirroring the PyTorch forward (batch=1)."""
    emb, w_ih, w_hh, b_ih, b_hh, w_out, b_out = params
    H = w_hh.shape[1]
    embeds = emb[sentence]                                     # (seq, E)

    def step(carry, x_t):
        h, c = carry
        gates = x_t @ w_ih.T + b_ih + h @ w_hh.T + b_hh        # (4H,)
        i = jax.nn.sigmoid(gates[0:H])
        f = jax.nn.sigmoid(gates[H:2 * H])
        g = jnp.tanh(gates[2 * H:3 * H])
        o = jax.nn.sigmoid(gates[3 * H:4 * H])
        c = f * c + i * g
        h = o * jnp.tanh(c)
        return (h, c), h

    h0 = jnp.zeros((H,), jnp.float32)
    c0 = jnp.zeros((H,), jnp.float32)
    _, hs = lax.scan(step, (h0, c0), embeds)                   # (seq, H)
    tag_space = hs @ w_out.T + b_out                           # (seq, T)
    return jax.nn.log_softmax(tag_space, axis=1)


if __name__ == "__main__":
    # Small shapes consistent with the module:
    #   vocab_size=16, embedding_dim=32, hidden_dim=32, tagset_size=8, seq_len=8
    vocab_size, embedding_dim, hidden_dim, tagset_size, seq_len = 16, 32, 32, 8, 8

    key = jax.random.PRNGKey(0)
    k = jax.random.split(key, 8)
    emb = 0.1 * jax.random.normal(k[0], (vocab_size, embedding_dim), jnp.float32)
    w_ih = 0.1 * jax.random.normal(k[1], (4 * hidden_dim, embedding_dim), jnp.float32)
    w_hh = 0.1 * jax.random.normal(k[2], (4 * hidden_dim, hidden_dim), jnp.float32)
    b_ih = 0.1 * jax.random.normal(k[3], (4 * hidden_dim,), jnp.float32)
    b_hh = 0.1 * jax.random.normal(k[4], (4 * hidden_dim,), jnp.float32)
    w_out = 0.1 * jax.random.normal(k[5], (tagset_size, hidden_dim), jnp.float32)
    b_out = 0.1 * jax.random.normal(k[6], (tagset_size,), jnp.float32)
    params = (emb, w_ih, w_hh, b_ih, b_hh, w_out, b_out)

    sentence = jax.random.randint(k[7], (seq_len,), 0, vocab_size, dtype=jnp.int32)

    # One-time parameter preparation (hoisted out of the per-call path).
    prepped, T = prepare_params(params)
    prepped = jax.tree_util.tree_map(jax.block_until_ready, prepped)

    out = jax.block_until_ready(lstm_tagger_forward(sentence, prepped, T))
    ref = jax.block_until_ready(lstm_tagger_reference(sentence, params))

    assert out.shape == (seq_len, tagset_size)
    # bf16 is only used for the two MXU weight operands (f32 accumulation, f32 state),
    # so the error vs. the pure-f32 reference stays well inside this tolerance.
    max_err = float(jnp.max(jnp.abs(out - ref)))
    assert jnp.allclose(out, ref, atol=1e-2, rtol=1e-3), (max_err, out, ref)
    print("KERNEL_OK")
</pallas_src>

<mosaic_0001>
module attributes {stable_mosaic.version = 11 : i64} {
  func.func @lstm_tagger_kernel(%arg0: i32, %arg1: memref<8xi32, #tpu.memory_space<smem>>, %arg2: memref<16x512xf32, #tpu.memory_space<any>>, %arg3: memref<128x512xbf16, #tpu.memory_space<vmem>>, %arg4: memref<128x128xbf16, #tpu.memory_space<vmem>>, %arg5: memref<1x128xf32, #tpu.memory_space<vmem>>, %arg6: memref<8x128xf32, #tpu.memory_space<vmem>>, %arg7: memref<8x512xf32, #tpu.memory_space<vmem>>, %arg8: memref<8x!tpu.dma_semaphore, #tpu.memory_space<semaphore_mem>>, %arg9: memref<8x128xf32, #tpu.memory_space<vmem>>) attributes {dimension_semantics = [#tpu.dimension_semantics<arbitrary>], iteration_bounds = array<i64: 1>, scalar_prefetch = 1 : i64, scratch_operands = 3 : i64, tpu.core_type = #tpu.core_type<tc>, window_params = [{}, {pipeline_mode = #tpu.pipeline_mode<synchronous>, transform_indices = @transform_1, window_bounds = array<i64: 128, 512>}, {pipeline_mode = #tpu.pipeline_mode<synchronous>, transform_indices = @transform_2, window_bounds = array<i64: 128, 128>}, {pipeline_mode = #tpu.pipeline_mode<synchronous>, transform_indices = @transform_3, window_bounds = array<i64: 1, 128>}, {pipeline_mode = #tpu.pipeline_mode<synchronous>, transform_indices = @transform_4, window_bounds = array<i64: 8, 128>}]} {
    %c0_i32 = arith.constant 0 : i32
    %c1_i32 = arith.constant 1 : i32
    %0 = arith.muli %c0_i32, %c1_i32 : i32
    %c0_i32_0 = arith.constant 0 : i32
    %1 = arith.addi %c0_i32_0, %0 : i32
    %2 = arith.index_cast %1 : i32 to index
    %3 = memref.load %arg1[%2] : memref<8xi32, #tpu.memory_space<smem>>
    %c0_i32_1 = arith.constant 0 : i32
    %4 = tpu.memref_slice %arg2[%3, %c0_i32_1] : memref<16x512xf32, #tpu.memory_space<any>> -> memref<1x512xf32, #tpu.memory_space<any>>
    %c0_i32_2 = arith.constant 0 : i32
    %5 = tpu.memref_slice %arg7[%1, %c0_i32_2] : memref<8x512xf32, #tpu.memory_space<vmem>> -> memref<1x512xf32, #tpu.memory_space<vmem>>
    %6 = tpu.memref_slice %arg8[%1] : memref<8x!tpu.dma_semaphore, #tpu.memory_space<semaphore_mem>> -> memref<1x!tpu.dma_semaphore, #tpu.memory_space<semaphore_mem>>
    %7 = tpu.memref_squeeze %6 : memref<1x!tpu.dma_semaphore, #tpu.memory_space<semaphore_mem>> -> memref<!tpu.dma_semaphore, #tpu.memory_space<semaphore_mem>>
    tpu.enqueue_dma source(%4 : memref<1x512xf32, #tpu.memory_space<any>>) target(%5 : memref<1x512xf32, #tpu.memory_space<vmem>>) target_semaphore(%7 : memref<!tpu.dma_semaphore, #tpu.memory_space<semaphore_mem>>)
    %c1_i32_3 = arith.constant 1 : i32
    %c1_i32_4 = arith.constant 1 : i32
    %8 = arith.muli %c1_i32_3, %c1_i32_4 : i32
    %c0_i32_5 = arith.constant 0 : i32
    %9 = arith.addi %c0_i32_5, %8 : i32
    %10 = arith.index_cast %9 : i32 to index
    %11 = memref.load %arg1[%10] : memref<8xi32, #tpu.memory_space<smem>>
    %c0_i32_6 = arith.constant 0 : i32
    %12 = tpu.memref_slice %arg2[%11, %c0_i32_6] : memref<16x512xf32, #tpu.memory_space<any>> -> memref<1x512xf32, #tpu.memory_space<any>>
    %c0_i32_7 = arith.constant 0 : i32
    %13 = tpu.memref_slice %arg7[%9, %c0_i32_7] : memref<8x512xf32, #tpu.memory_space<vmem>> -> memref<1x512xf32, #tpu.memory_space<vmem>>
    %14 = tpu.memref_slice %arg8[%9] : memref<8x!tpu.dma_semaphore, #tpu.memory_space<semaphore_mem>> -> memref<1x!tpu.dma_semaphore, #tpu.memory_space<semaphore_mem>>
    %15 = tpu.memref_squeeze %14 : memref<1x!tpu.dma_semaphore, #tpu.memory_space<semaphore_mem>> -> memref<!tpu.dma_semaphore, #tpu.memory_space<semaphore_mem>>
    tpu.enqueue_dma source(%12 : memref<1x512xf32, #tpu.memory_space<any>>) target(%13 : memref<1x512xf32, #tpu.memory_space<vmem>>) target_semaphore(%15 : memref<!tpu.dma_semaphore, #tpu.memory_space<semaphore_mem>>)
    %c2_i32 = arith.constant 2 : i32
    %c1_i32_8 = arith.constant 1 : i32
    %16 = arith.muli %c2_i32, %c1_i32_8 : i32
    %c0_i32_9 = arith.constant 0 : i32
    %17 = arith.addi %c0_i32_9, %16 : i32
    %18 = arith.index_cast %17 : i32 to index
    %19 = memref.load %arg1[%18] : memref<8xi32, #tpu.memory_space<smem>>
    %c0_i32_10 = arith.constant 0 : i32
    %20 = tpu.memref_slice %arg2[%19, %c0_i32_10] : memref<16x512xf32, #tpu.memory_space<any>> -> memref<1x512xf32, #tpu.memory_space<any>>
    %c0_i32_11 = arith.constant 0 : i32
    %21 = tpu.memref_slice %arg7[%17, %c0_i32_11] : memref<8x512xf32, #tpu.memory_space<vmem>> -> memref<1x512xf32, #tpu.memory_space<vmem>>
    %22 = tpu.memref_slice %arg8[%17] : memref<8x!tpu.dma_semaphore, #tpu.memory_space<semaphore_mem>> -> memref<1x!tpu.dma_semaphore, #tpu.memory_space<semaphore_mem>>
    %23 = tpu.memref_squeeze %22 : memref<1x!tpu.dma_semaphore, #tpu.memory_space<semaphore_mem>> -> memref<!tpu.dma_semaphore, #tpu.memory_space<semaphore_mem>>
    tpu.enqueue_dma source(%20 : memref<1x512xf32, #tpu.memory_space<any>>) target(%21 : memref<1x512xf32, #tpu.memory_space<vmem>>) target_semaphore(%23 : memref<!tpu.dma_semaphore, #tpu.memory_space<semaphore_mem>>)
    %c3_i32 = arith.constant 3 : i32
    %c1_i32_12 = arith.constant 1 : i32
    %24 = arith.muli %c3_i32, %c1_i32_12 : i32
    %c0_i32_13 = arith.constant 0 : i32
    %25 = arith.addi %c0_i32_13, %24 : i32
    %26 = arith.index_cast %25 : i32 to index
    %27 = memref.load %arg1[%26] : memref<8xi32, #tpu.memory_space<smem>>
    %c0_i32_14 = arith.constant 0 : i32
    %28 = tpu.memref_slice %arg2[%27, %c0_i32_14] : memref<16x512xf32, #tpu.memory_space<any>> -> memref<1x512xf32, #tpu.memory_space<any>>
    %c0_i32_15 = arith.constant 0 : i32
    %29 = tpu.memref_slice %arg7[%25, %c0_i32_15] : memref<8x512xf32, #tpu.memory_space<vmem>> -> memref<1x512xf32, #tpu.memory_space<vmem>>
    %30 = tpu.memref_slice %arg8[%25] : memref<8x!tpu.dma_semaphore, #tpu.memory_space<semaphore_mem>> -> memref<1x!tpu.dma_semaphore, #tpu.memory_space<semaphore_mem>>
    %31 = tpu.memref_squeeze %30 : memref<1x!tpu.dma_semaphore, #tpu.memory_space<semaphore_mem>> -> memref<!tpu.dma_semaphore, #tpu.memory_space<semaphore_mem>>
    tpu.enqueue_dma source(%28 : memref<1x512xf32, #tpu.memory_space<any>>) target(%29 : memref<1x512xf32, #tpu.memory_space<vmem>>) target_semaphore(%31 : memref<!tpu.dma_semaphore, #tpu.memory_space<semaphore_mem>>)
    %c4_i32 = arith.constant 4 : i32
    %c1_i32_16 = arith.constant 1 : i32
    %32 = arith.muli %c4_i32, %c1_i32_16 : i32
    %c0_i32_17 = arith.constant 0 : i32
    %33 = arith.addi %c0_i32_17, %32 : i32
    %34 = arith.index_cast %33 : i32 to index
    %35 = memref.load %arg1[%34] : memref<8xi32, #tpu.memory_space<smem>>
    %c0_i32_18 = arith.constant 0 : i32
    %36 = tpu.memref_slice %arg2[%35, %c0_i32_18] : memref<16x512xf32, #tpu.memory_space<any>> -> memref<1x512xf32, #tpu.memory_space<any>>
    %c0_i32_19 = arith.constant 0 : i32
    %37 = tpu.memref_slice %arg7[%33, %c0_i32_19] : memref<8x512xf32, #tpu.memory_space<vmem>> -> memref<1x512xf32, #tpu.memory_space<vmem>>
    %38 = tpu.memref_slice %arg8[%33] : memref<8x!tpu.dma_semaphore, #tpu.memory_space<semaphore_mem>> -> memref<1x!tpu.dma_semaphore, #tpu.memory_space<semaphore_mem>>
    %39 = tpu.memref_squeeze %38 : memref<1x!tpu.dma_semaphore, #tpu.memory_space<semaphore_mem>> -> memref<!tpu.dma_semaphore, #tpu.memory_space<semaphore_mem>>
    tpu.enqueue_dma source(%36 : memref<1x512xf32, #tpu.memory_space<any>>) target(%37 : memref<1x512xf32, #tpu.memory_space<vmem>>) target_semaphore(%39 : memref<!tpu.dma_semaphore, #tpu.memory_space<semaphore_mem>>)
    %c5_i32 = arith.constant 5 : i32
    %c1_i32_20 = arith.constant 1 : i32
    %40 = arith.muli %c5_i32, %c1_i32_20 : i32
    %c0_i32_21 = arith.constant 0 : i32
    %41 = arith.addi %c0_i32_21, %40 : i32
    %42 = arith.index_cast %41 : i32 to index
    %43 = memref.load %arg1[%42] : memref<8xi32, #tpu.memory_space<smem>>
    %c0_i32_22 = arith.constant 0 : i32
    %44 = tpu.memref_slice %arg2[%43, %c0_i32_22] : memref<16x512xf32, #tpu.memory_space<any>> -> memref<1x512xf32, #tpu.memory_space<any>>
    %c0_i32_23 = arith.constant 0 : i32
    %45 = tpu.memref_slice %arg7[%41, %c0_i32_23] : memref<8x512xf32, #tpu.memory_space<vmem>> -> memref<1x512xf32, #tpu.memory_space<vmem>>
    %46 = tpu.memref_slice %arg8[%41] : memref<8x!tpu.dma_semaphore, #tpu.memory_space<semaphore_mem>> -> memref<1x!tpu.dma_semaphore, #tpu.memory_space<semaphore_mem>>
    %47 = tpu.memref_squeeze %46 : memref<1x!tpu.dma_semaphore, #tpu.memory_space<semaphore_mem>> -> memref<!tpu.dma_semaphore, #tpu.memory_space<semaphore_mem>>
    tpu.enqueue_dma source(%44 : memref<1x512xf32, #tpu.memory_space<any>>) target(%45 : memref<1x512xf32, #tpu.memory_space<vmem>>) target_semaphore(%47 : memref<!tpu.dma_semaphore, #tpu.memory_space<semaphore_mem>>)
    %c6_i32 = arith.constant 6 : i32
    %c1_i32_24 = arith.constant 1 : i32
    %48 = arith.muli %c6_i32, %c1_i32_24 : i32
    %c0_i32_25 = arith.constant 0 : i32
    %49 = arith.addi %c0_i32_25, %48 : i32
    %50 = arith.index_cast %49 : i32 to index
    %51 = memref.load %arg1[%50] : memref<8xi32, #tpu.memory_space<smem>>
    %c0_i32_26 = arith.constant 0 : i32
    %52 = tpu.memref_slice %arg2[%51, %c0_i32_26] : memref<16x512xf32, #tpu.memory_space<any>> -> memref<1x512xf32, #tpu.memory_space<any>>
    %c0_i32_27 = arith.constant 0 : i32
    %53 = tpu.memref_slice %arg7[%49, %c0_i32_27] : memref<8x512xf32, #tpu.memory_space<vmem>> -> memref<1x512xf32, #tpu.memory_space<vmem>>
    %54 = tpu.memref_slice %arg8[%49] : memref<8x!tpu.dma_semaphore, #tpu.memory_space<semaphore_mem>> -> memref<1x!tpu.dma_semaphore, #tpu.memory_space<semaphore_mem>>
    %55 = tpu.memref_squeeze %54 : memref<1x!tpu.dma_semaphore, #tpu.memory_space<semaphore_mem>> -> memref<!tpu.dma_semaphore, #tpu.memory_space<semaphore_mem>>
    tpu.enqueue_dma source(%52 : memref<1x512xf32, #tpu.memory_space<any>>) target(%53 : memref<1x512xf32, #tpu.memory_space<vmem>>) target_semaphore(%55 : memref<!tpu.dma_semaphore, #tpu.memory_space<semaphore_mem>>)
    %c7_i32 = arith.constant 7 : i32
    %c1_i32_28 = arith.constant 1 : i32
    %56 = arith.muli %c7_i32, %c1_i32_28 : i32
    %c0_i32_29 = arith.constant 0 : i32
    %57 = arith.addi %c0_i32_29, %56 : i32
    %58 = arith.index_cast %57 : i32 to index
    %59 = memref.load %arg1[%58] : memref<8xi32, #tpu.memory_space<smem>>
    %c0_i32_30 = arith.constant 0 : i32
    %60 = tpu.memref_slice %arg2[%59, %c0_i32_30] : memref<16x512xf32, #tpu.memory_space<any>> -> memref<1x512xf32, #tpu.memory_space<any>>
    %c0_i32_31 = arith.constant 0 : i32
    %61 = tpu.memref_slice %arg7[%57, %c0_i32_31] : memref<8x512xf32, #tpu.memory_space<vmem>> -> memref<1x512xf32, #tpu.memory_space<vmem>>
    %62 = tpu.memref_slice %arg8[%57] : memref<8x!tpu.dma_semaphore, #tpu.memory_space<semaphore_mem>> -> memref<1x!tpu.dma_semaphore, #tpu.memory_space<semaphore_mem>>
    %63 = tpu.memref_squeeze %62 : memref<1x!tpu.dma_semaphore, #tpu.memory_space<semaphore_mem>> -> memref<!tpu.dma_semaphore, #tpu.memory_space<semaphore_mem>>
    tpu.enqueue_dma source(%60 : memref<1x512xf32, #tpu.memory_space<any>>) target(%61 : memref<1x512xf32, #tpu.memory_space<vmem>>) target_semaphore(%63 : memref<!tpu.dma_semaphore, #tpu.memory_space<semaphore_mem>>)
    %c8_i32 = arith.constant 8 : i32
    %cst = arith.constant 0.000000e+00 : f32
    %64 = vector.broadcast %cst : f32 to vector<1x128xf32>
    %cst_32 = arith.constant 0.000000e+00 : f32
    %65 = vector.broadcast %cst_32 : f32 to vector<1x128xf32>
    %c0_i32_33 = arith.constant 0 : i32
    %c0_i32_34 = arith.constant 0 : i32
    %c0_i32_35 = arith.constant 0 : i32
    %66 = tpu.memref_slice %arg2[%c0_i32_34, %c0_i32_35] : memref<16x512xf32, #tpu.memory_space<any>> -> memref<1x512xf32, #tpu.memory_space<any>>
    %c0_i32_36 = arith.constant 0 : i32
    %67 = tpu.memref_slice %arg7[%c0_i32_33, %c0_i32_36] : memref<8x512xf32, #tpu.memory_space<vmem>> -> memref<1x512xf32, #tpu.memory_space<vmem>>
    %68 = tpu.memref_slice %arg8[%c0_i32_33] : memref<8x!tpu.dma_semaphore, #tpu.memory_space<semaphore_mem>> -> memref<1x!tpu.dma_semaphore, #tpu.memory_space<semaphore_mem>>
    %69 = tpu.memref_squeeze %68 : memref<1x!tpu.dma_semaphore, #tpu.memory_space<semaphore_mem>> -> memref<!tpu.dma_semaphore, #tpu.memory_space<semaphore_mem>>
    tpu.wait_dma2 semaphore(%69 : memref<!tpu.dma_semaphore, #tpu.memory_space<semaphore_mem>>) src(%66 : memref<1x512xf32, #tpu.memory_space<any>>) dst(%67 : memref<1x512xf32, #tpu.memory_space<vmem>>)
    %70 = arith.index_cast %c0_i32_33 : i32 to index
    %c0 = arith.constant 0 : index
    %71 = vector.load %arg7[%70, %c0] : memref<8x512xf32, #tpu.memory_space<vmem>>, vector<1x512xf32>
    %72 = arith.truncf %64 : vector<1x128xf32> to vector<1x128xbf16>
    %c0_37 = arith.constant 0 : index
    %c0_38 = arith.constant 0 : index
    %73 = vector.load %arg3[%c0_37, %c0_38] : memref<128x512xbf16, #tpu.memory_space<vmem>>, vector<128x512xbf16>
    %cst_39 = arith.constant dense<0.000000e+00> : vector<1x512xf32>
    %74 = tpu.matmul %72, %73, %cst_39 {dimension_numbers = #tpu.dot_dimension_numbers<[1], [0], [0], [1], [0, 0, 1, 1], [], []>} : vector<1x128xbf16>, vector<128x512xbf16>, vector<1x512xf32> -> vector<1x512xf32>
    %75 = arith.addf %71, %74 : vector<1x512xf32>
    %76 = arith.negf %75 : vector<1x512xf32>
    %77 = math.exp %76 : vector<1x512xf32>
    %cst_40 = arith.constant 1.000000e+00 : f32
    %78 = vector.broadcast %cst_40 : f32 to vector<1x512xf32>
    %79 = arith.addf %78, %77 : vector<1x512xf32>
    %80 = arith.divf %78, %79 : vector<1x512xf32>
    %81 = vector.extract_strided_slice %80 {offsets = [0, 0], sizes = [1, 128], strides = [1, 1]} : vector<1x512xf32> to vector<1x128xf32>
    %82 = vector.extract_strided_slice %80 {offsets = [0, 128], sizes = [1, 128], strides = [1, 1]} : vector<1x512xf32> to vector<1x128xf32>
    %83 = vector.extract_strided_slice %80 {offsets = [0, 384], sizes = [1, 128], strides = [1, 1]} : vector<1x512xf32> to vector<1x128xf32>
    %84 = vector.extract_strided_slice %75 {offsets = [0, 256], sizes = [1, 128], strides = [1, 1]} : vector<1x512xf32> to vector<1x128xf32>
    %85 = math.tanh %84 : vector<1x128xf32>
    %86 = arith.mulf %82, %65 : vector<1x128xf32>
    %87 = arith.mulf %81, %85 : vector<1x128xf32>
    %88 = arith.addf %86, %87 : vector<1x128xf32>
    %89 = math.tanh %88 : vector<1x128xf32>
    %90 = arith.mulf %83, %89 : vector<1x128xf32>
    %91 = arith.index_cast %c0_i32_33 : i32 to index
    %c0_41 = arith.constant 0 : index
    %92 = vector.load %arg9[%91, %c0_41] : memref<8x128xf32, #tpu.memory_space<vmem>>, vector<1x128xf32>
    tpu.vector_store %arg9[%91, %c0_41], %90 {strides = array<i32>} : memref<8x128xf32, #tpu.memory_space<vmem>>, vector<1x128xf32>,
    %c1_i32_42 = arith.constant 1 : i32
    %c0_i32_43 = arith.constant 0 : i32
    %c0_i32_44 = arith.constant 0 : i32
    %93 = tpu.memref_slice %arg2[%c0_i32_43, %c0_i32_44] : memref<16x512xf32, #tpu.memory_space<any>> -> memref<1x512xf32, #tpu.memory_space<any>>
    %c0_i32_45 = arith.constant 0 : i32
    %94 = tpu.memref_slice %arg7[%c1_i32_42, %c0_i32_45] : memref<8x512xf32, #tpu.memory_space<vmem>> -> memref<1x512xf32, #tpu.memory_space<vmem>>
    %95 = tpu.memref_slice %arg8[%c1_i32_42] : memref<8x!tpu.dma_semaphore, #tpu.memory_space<semaphore_mem>> -> memref<1x!tpu.dma_semaphore, #tpu.memory_space<semaphore_mem>>
    %96 = tpu.memref_squeeze %95 : memref<1x!tpu.dma_semaphore, #tpu.memory_space<semaphore_mem>> -> memref<!tpu.dma_semaphore, #tpu.memory_space<semaphore_mem>>
    tpu.wait_dma2 semaphore(%96 : memref<!tpu.dma_semaphore, #tpu.memory_space<semaphore_mem>>) src(%93 : memref<1x512xf32, #tpu.memory_space<any>>) dst(%94 : memref<1x512xf32, #tpu.memory_space<vmem>>)
    %97 = arith.index_cast %c1_i32_42 : i32 to index
    %c0_46 = arith.constant 0 : index
    %98 = vector.load %arg7[%97, %c0_46] : memref<8x512xf32, #tpu.memory_space<vmem>>, vector<1x512xf32>
    %99 = arith.truncf %90 : vector<1x128xf32> to vector<1x128xbf16>
    %c0_47 = arith.constant 0 : index
    %c0_48 = arith.constant 0 : index
    %100 = vector.load %arg3[%c0_47, %c0_48] : memref<128x512xbf16, #tpu.memory_space<vmem>>, vector<128x512xbf16>
    %cst_49 = arith.constant dense<0.000000e+00> : vector<1x512xf32>
    %101 = tpu.matmul %99, %100, %cst_49 {dimension_numbers = #tpu.dot_dimension_numbers<[1], [0], [0], [1], [0, 0, 1, 1], [], []>} : vector<1x128xbf16>, vector<128x512xbf16>, vector<1x512xf32> -> vector<1x512xf32>
    %102 = arith.addf %98, %101 : vector<1x512xf32>
    %103 = arith.negf %102 : vector<1x512xf32>
    %104 = math.exp %103 : vector<1x512xf32>
    %cst_50 = arith.constant 1.000000e+00 : f32
    %105 = vector.broadcast %cst_50 : f32 to vector<1x512xf32>
    %106 = arith.addf %105, %104 : vector<1x512xf32>
    %107 = arith.divf %105, %106 : vector<1x512xf32>
    %108 = vector.extract_strided_slice %107 {offsets = [0, 0], sizes = [1, 128], strides = [1, 1]} : vector<1x512xf32> to vector<1x128xf32>
    %109 = vector.extract_strided_slice %107 {offsets = [0, 128], sizes = [1, 128], strides = [1, 1]} : vector<1x512xf32> to vector<1x128xf32>
    %110 = vector.extract_strided_slice %107 {offsets = [0, 384], sizes = [1, 128], strides = [1, 1]} : vector<1x512xf32> to vector<1x128xf32>
    %111 = vector.extract_strided_slice %102 {offsets = [0, 256], sizes = [1, 128], strides = [1, 1]} : vector<1x512xf32> to vector<1x128xf32>
    %112 = math.tanh %111 : vector<1x128xf32>
    %113 = arith.mulf %109, %88 : vector<1x128xf32>
    %114 = arith.mulf %108, %112 : vector<1x128xf32>
    %115 = arith.addf %113, %114 : vector<1x128xf32>
    %116 = math.tanh %115 : vector<1x128xf32>
    %117 = arith.mulf %110, %116 : vector<1x128xf32>
    %118 = arith.index_cast %c1_i32_42 : i32 to index
    %c0_51 = arith.constant 0 : index
    %119 = vector.load %arg9[%118, %c0_51] : memref<8x128xf32, #tpu.memory_space<vmem>>, vector<1x128xf32>
    tpu.vector_store %arg9[%118, %c0_51], %117 {strides = array<i32>} : memref<8x128xf32, #tpu.memory_space<vmem>>, vector<1x128xf32>,
    %c2_i32_52 = arith.constant 2 : i32
    %c0_i32_53 = arith.constant 0 : i32
    %c0_i32_54 = arith.constant 0 : i32
    %120 = tpu.memref_slice %arg2[%c0_i32_53, %c0_i32_54] : memref<16x512xf32, #tpu.memory_space<any>> -> memref<1x512xf32, #tpu.memory_space<any>>
    %c0_i32_55 = arith.constant 0 : i32
    %121 = tpu.memref_slice %arg7[%c2_i32_52, %c0_i32_55] : memref<8x512xf32, #tpu.memory_space<vmem>> -> memref<1x512xf32, #tpu.memory_space<vmem>>
    %122 = tpu.memref_slice %arg8[%c2_i32_52] : memref<8x!tpu.dma_semaphore, #tpu.memory_space<semaphore_mem>> -> memref<1x!tpu.dma_semaphore, #tpu.memory_space<semaphore_mem>>
    %123 = tpu.memref_squeeze %122 : memref<1x!tpu.dma_semaphore, #tpu.memory_space<semaphore_mem>> -> memref<!tpu.dma_semaphore, #tpu.memory_space<semaphore_mem>>
    tpu.wait_dma2 semaphore(%123 : memref<!tpu.dma_semaphore, #tpu.memory_space<semaphore_mem>>) src(%120 : memref<1x512xf32, #tpu.memory_space<any>>) dst(%121 : memref<1x512xf32, #tpu.memory_space<vmem>>)
    %124 = arith.index_cast %c2_i32_52 : i32 to index
    %c0_56 = arith.constant 0 : index
    %125 = vector.load %arg7[%124, %c0_56] : memref<8x512xf32, #tpu.memory_space<vmem>>, vector<1x512xf32>
    %126 = arith.truncf %117 : vector<1x128xf32> to vector<1x128xbf16>
    %c0_57 = arith.constant 0 : index
    %c0_58 = arith.constant 0 : index
    %127 = vector.load %arg3[%c0_57, %c0_58] : memref<128x512xbf16, #tpu.memory_space<vmem>>, vector<128x512xbf16>
    %cst_59 = arith.constant dense<0.000000e+00> : vector<1x512xf32>
    %128 = tpu.matmul %126, %127, %cst_59 {dimension_numbers = #tpu.dot_dimension_numbers<[1], [0], [0], [1], [0, 0, 1, 1], [], []>} : vector<1x128xbf16>, vector<128x512xbf16>, vector<1x512xf32> -> vector<1x512xf32>
    %129 = arith.addf %125, %128 : vector<1x512xf32>
    %130 = arith.negf %129 : vector<1x512xf32>
    %131 = math.exp %130 : vector<1x512xf32>
    %cst_60 = arith.constant 1.000000e+00 : f32
    %132 = vector.broadcast %cst_60 : f32 to vector<1x512xf32>
    %133 = arith.addf %132, %131 : vector<1x512xf32>
    %134 = arith.divf %132, %133 : vector<1x512xf32>
    %135 = vector.extract_strided_slice %134 {offsets = [0, 0], sizes = [1, 128], strides = [1, 1]} : vector<1x512xf32> to vector<1x128xf32>
    %136 = vector.extract_strided_slice %134 {offsets = [0, 128], sizes = [1, 128], strides = [1, 1]} : vector<1x512xf32> to vector<1x128xf32>
    %137 = vector.extract_strided_slice %134 {offsets = [0, 384], sizes = [1, 128], strides = [1, 1]} : vector<1x512xf32> to vector<1x128xf32>
    %138 = vector.extract_strided_slice %129 {offsets = [0, 256], sizes = [1, 128], strides = [1, 1]} : vector<1x512xf32> to vector<1x128xf32>
    %139 = math.tanh %138 : vector<1x128xf32>
    %140 = arith.mulf %136, %115 : vector<1x128xf32>
    %141 = arith.mulf %135, %139 : vector<1x128xf32>
    %142 = arith.addf %140, %141 : vector<1x128xf32>
    %143 = math.tanh %142 : vector<1x128xf32>
    %144 = arith.mulf %137, %143 : vector<1x128xf32>
    %145 = arith.index_cast %c2_i32_52 : i32 to index
    %c0_61 = arith.constant 0 : index
    %146 = vector.load %arg9[%145, %c0_61] : memref<8x128xf32, #tpu.memory_space<vmem>>, vector<1x128xf32>
    tpu.vector_store %arg9[%145, %c0_61], %144 {strides = array<i32>} : memref<8x128xf32, #tpu.memory_space<vmem>>, vector<1x128xf32>,
    %c3_i32_62 = arith.constant 3 : i32
    %c0_i32_63 = arith.constant 0 : i32
    %c0_i32_64 = arith.constant 0 : i32
    %147 = tpu.memref_slice %arg2[%c0_i32_63, %c0_i32_64] : memref<16x512xf32, #tpu.memory_space<any>> -> memref<1x512xf32, #tpu.memory_space<any>>
    %c0_i32_65 = arith.constant 0 : i32
    %148 = tpu.memref_slice %arg7[%c3_i32_62, %c0_i32_65] : memref<8x512xf32, #tpu.memory_space<vmem>> -> memref<1x512xf32, #tpu.memory_space<vmem>>
    %149 = tpu.memref_slice %arg8[%c3_i32_62] : memref<8x!tpu.dma_semaphore, #tpu.memory_space<semaphore_mem>> -> memref<1x!tpu.dma_semaphore, #tpu.memory_space<semaphore_mem>>
    %150 = tpu.memref_squeeze %149 : memref<1x!tpu.dma_semaphore, #tpu.memory_space<semaphore_mem>> -> memref<!tpu.dma_semaphore, #tpu.memory_space<semaphore_mem>>
    tpu.wait_dma2 semaphore(%150 : memref<!tpu.dma_semaphore, #tpu.memory_space<semaphore_mem>>) src(%147 : memref<1x512xf32, #tpu.memory_space<any>>) dst(%148 : memref<1x512xf32, #tpu.memory_space<vmem>>)
    %151 = arith.index_cast %c3_i32_62 : i32 to index
    %c0_66 = arith.constant 0 : index
    %152 = vector.load %arg7[%151, %c0_66] : memref<8x512xf32, #tpu.memory_space<vmem>>, vector<1x512xf32>
    %153 = arith.truncf %144 : vector<1x128xf32> to vector<1x128xbf16>
    %c0_67 = arith.constant 0 : index
    %c0_68 = arith.constant 0 : index
    %154 = vector.load %arg3[%c0_67, %c0_68] : memref<128x512xbf16, #tpu.memory_space<vmem>>, vector<128x512xbf16>
    %cst_69 = arith.constant dense<0.000000e+00> : vector<1x512xf32>
    %155 = tpu.matmul %153, %154, %cst_69 {dimension_numbers = #tpu.dot_dimension_numbers<[1], [0], [0], [1], [0, 0, 1, 1], [], []>} : vector<1x128xbf16>, vector<128x512xbf16>, vector<1x512xf32> -> vector<1x512xf32>
    %156 = arith.addf %152, %155 : vector<1x512xf32>
    %157 = arith.negf %156 : vector<1x512xf32>
    %158 = math.exp %157 : vector<1x512xf32>
    %cst_70 = arith.constant 1.000000e+00 : f32
    %159 = vector.broadcast %cst_70 : f32 to vector<1x512xf32>
    %160 = arith.addf %159, %158 : vector<1x512xf32>
    %161 = arith.divf %159, %160 : vector<1x512xf32>
    %162 = vector.extract_strided_slice %161 {offsets = [0, 0], sizes = [1, 128], strides = [1, 1]} : vector<1x512xf32> to vector<1x128xf32>
    %163 = vector.extract_strided_slice %161 {offsets = [0, 128], sizes = [1, 128], strides = [1, 1]} : vector<1x512xf32> to vector<1x128xf32>
    %164 = vector.extract_strided_slice %161 {offsets = [0, 384], sizes = [1, 128], strides = [1, 1]} : vector<1x512xf32> to vector<1x128xf32>
    %165 = vector.extract_strided_slice %156 {offsets = [0, 256], sizes = [1, 128], strides = [1, 1]} : vector<1x512xf32> to vector<1x128xf32>
    %166 = math.tanh %165 : vector<1x128xf32>
    %167 = arith.mulf %163, %142 : vector<1x128xf32>
    %168 = arith.mulf %162, %166 : vector<1x128xf32>
    %169 = arith.addf %167, %168 : vector<1x128xf32>
    %170 = math.tanh %169 : vector<1x128xf32>
    %171 = arith.mulf %164, %170 : vector<1x128xf32>
    %172 = arith.index_cast %c3_i32_62 : i32 to index
    %c0_71 = arith.constant 0 : index
    %173 = vector.load %arg9[%172, %c0_71] : memref<8x128xf32, #tpu.memory_space<vmem>>, vector<1x128xf32>
    tpu.vector_store %arg9[%172, %c0_71], %171 {strides = array<i32>} : memref<8x128xf32, #tpu.memory_space<vmem>>, vector<1x128xf32>,
    %c4_i32_72 = arith.constant 4 : i32
    %c0_i32_73 = arith.constant 0 : i32
    %c0_i32_74 = arith.constant 0 : i32
    %174 = tpu.memref_slice %arg2[%c0_i32_73, %c0_i32_74] : memref<16x512xf32, #tpu.memory_space<any>> -> memref<1x512xf32, #tpu.memory_space<any>>
    %c0_i32_75 = arith.constant 0 : i32
    %175 = tpu.memref_slice %arg7[%c4_i32_72, %c0_i32_75] : memref<8x512xf32, #tpu.memory_space<vmem>> -> memref<1x512xf32, #tpu.memory_space<vmem>>
    %176 = tpu.memref_slice %arg8[%c4_i32_72] : memref<8x!tpu.dma_semaphore, #tpu.memory_space<semaphore_mem>> -> memref<1x!tpu.dma_semaphore, #tpu.memory_space<semaphore_mem>>
    %177 = tpu.memref_squeeze %176 : memref<1x!tpu.dma_semaphore, #tpu.memory_space<semaphore_mem>> -> memref<!tpu.dma_semaphore, #tpu.memory_space<semaphore_mem>>
    tpu.wait_dma2 semaphore(%177 : memref<!tpu.dma_semaphore, #tpu.memory_space<semaphore_mem>>) src(%174 : memref<1x512xf32, #tpu.memory_space<any>>) dst(%175 : memref<1x512xf32, #tpu.memory_space<vmem>>)
    %178 = arith.index_cast %c4_i32_72 : i32 to index
    %c0_76 = arith.constant 0 : index
    %179 = vector.load %arg7[%178, %c0_76] : memref<8x512xf32, #tpu.memory_space<vmem>>, vector<1x512xf32>
    %180 = arith.truncf %171 : vector<1x128xf32> to vector<1x128xbf16>
    %c0_77 = arith.constant 0 : index
    %c0_78 = arith.constant 0 : index
    %181 = vector.load %arg3[%c0_77, %c0_78] : memref<128x512xbf16, #tpu.memory_space<vmem>>, vector<128x512xbf16>
    %cst_79 = arith.constant dense<0.000000e+00> : vector<1x512xf32>
    %182 = tpu.matmul %180, %181, %cst_79 {dimension_numbers = #tpu.dot_dimension_numbers<[1], [0], [0], [1], [0, 0, 1, 1], [], []>} : vector<1x128xbf16>, vector<128x512xbf16>, vector<1x512xf32> -> vector<1x512xf32>
    %183 = arith.addf %179, %182 : vector<1x512xf32>
    %184 = arith.negf %183 : vector<1x512xf32>
    %185 = math.exp %184 : vector<1x512xf32>
    %cst_80 = arith.constant 1.000000e+00 : f32
    %186 = vector.broadcast %cst_80 : f32 to vector<1x512xf32>
    %187 = arith.addf %186, %185 : vector<1x512xf32>
    %188 = arith.divf %186, %187 : vector<1x512xf32>
    %189 = vector.extract_strided_slice %188 {offsets = [0, 0], sizes = [1, 128], strides = [1, 1]} : vector<1x512xf32> to vector<1x128xf32>
    %190 = vector.extract_strided_slice %188 {offsets = [0, 128], sizes = [1, 128], strides = [1, 1]} : vector<1x512xf32> to vector<1x128xf32>
    %191 = vector.extract_strided_slice %188 {offsets = [0, 384], sizes = [1, 128], strides = [1, 1]} : vector<1x512xf32> to vector<1x128xf32>
    %192 = vector.extract_strided_slice %183 {offsets = [0, 256], sizes = [1, 128], strides = [1, 1]} : vector<1x512xf32> to vector<1x128xf32>
    %193 = math.tanh %192 : vector<1x128xf32>
    %194 = arith.mulf %190, %169 : vector<1x128xf32>
    %195 = arith.mulf %189, %193 : vector<1x128xf32>
    %196 = arith.addf %194, %195 : vector<1x128xf32>
    %197 = math.tanh %196 : vector<1x128xf32>
    %198 = arith.mulf %191, %197 : vector<1x128xf32>
    %199 = arith.index_cast %c4_i32_72 : i32 to index
    %c0_81 = arith.constant 0 : index
    %200 = vector.load %arg9[%199, %c0_81] : memref<8x128xf32, #tpu.memory_space<vmem>>, vector<1x128xf32>
    tpu.vector_store %arg9[%199, %c0_81], %198 {strides = array<i32>} : memref<8x128xf32, #tpu.memory_space<vmem>>, vector<1x128xf32>,
    %c5_i32_82 = arith.constant 5 : i32
    %c0_i32_83 = arith.constant 0 : i32
    %c0_i32_84 = arith.constant 0 : i32
    %201 = tpu.memref_slice %arg2[%c0_i32_83, %c0_i32_84] : memref<16x512xf32, #tpu.memory_space<any>> -> memref<1x512xf32, #tpu.memory_space<any>>
    %c0_i32_85 = arith.constant 0 : i32
    %202 = tpu.memref_slice %arg7[%c5_i32_82, %c0_i32_85] : memref<8x512xf32, #tpu.memory_space<vmem>> -> memref<1x512xf32, #tpu.memory_space<vmem>>
    %203 = tpu.memref_slice %arg8[%c5_i32_82] : memref<8x!tpu.dma_semaphore, #tpu.memory_space<semaphore_mem>> -> memref<1x!tpu.dma_semaphore, #tpu.memory_space<semaphore_mem>>
    %204 = tpu.memref_squeeze %203 : memref<1x!tpu.dma_semaphore, #tpu.memory_space<semaphore_mem>> -> memref<!tpu.dma_semaphore, #tpu.memory_space<semaphore_mem>>
    tpu.wait_dma2 semaphore(%204 : memref<!tpu.dma_semaphore, #tpu.memory_space<semaphore_mem>>) src(%201 : memref<1x512xf32, #tpu.memory_space<any>>) dst(%202 : memref<1x512xf32, #tpu.memory_space<vmem>>)
    %205 = arith.index_cast %c5_i32_82 : i32 to index
    %c0_86 = arith.constant 0 : index
    %206 = vector.load %arg7[%205, %c0_86] : memref<8x512xf32, #tpu.memory_space<vmem>>, vector<1x512xf32>
    %207 = arith.truncf %198 : vector<1x128xf32> to vector<1x128xbf16>
    %c0_87 = arith.constant 0 : index
    %c0_88 = arith.constant 0 : index
    %208 = vector.load %arg3[%c0_87, %c0_88] : memref<128x512xbf16, #tpu.memory_space<vmem>>, vector<128x512xbf16>
    %cst_89 = arith.constant dense<0.000000e+00> : vector<1x512xf32>
    %209 = tpu.matmul %207, %208, %cst_89 {dimension_numbers = #tpu.dot_dimension_numbers<[1], [0], [0], [1], [0, 0, 1, 1], [], []>} : vector<1x128xbf16>, vector<128x512xbf16>, vector<1x512xf32> -> vector<1x512xf32>
    %210 = arith.addf %206, %209 : vector<1x512xf32>
    %211 = arith.negf %210 : vector<1x512xf32>
    %212 = math.exp %211 : vector<1x512xf32>
    %cst_90 = arith.constant 1.000000e+00 : f32
    %213 = vector.broadcast %cst_90 : f32 to vector<1x512xf32>
    %214 = arith.addf %213, %212 : vector<1x512xf32>
    %215 = arith.divf %213, %214 : vector<1x512xf32>
    %216 = vector.extract_strided_slice %215 {offsets = [0, 0], sizes = [1, 128], strides = [1, 1]} : vector<1x512xf32> to vector<1x128xf32>
    %217 = vector.extract_strided_slice %215 {offsets = [0, 128], sizes = [1, 128], strides = [1, 1]} : vector<1x512xf32> to vector<1x128xf32>
    %218 = vector.extract_strided_slice %215 {offsets = [0, 384], sizes = [1, 128], strides = [1, 1]} : vector<1x512xf32> to vector<1x128xf32>
    %219 = vector.extract_strided_slice %210 {offsets = [0, 256], sizes = [1, 128], strides = [1, 1]} : vector<1x512xf32> to vector<1x128xf32>
    %220 = math.tanh %219 : vector<1x128xf32>
    %221 = arith.mulf %217, %196 : vector<1x128xf32>
    %222 = arith.mulf %216, %220 : vector<1x128xf32>
    %223 = arith.addf %221, %222 : vector<1x128xf32>
    %224 = math.tanh %223 : vector<1x128xf32>
    %225 = arith.mulf %218, %224 : vector<1x128xf32>
    %226 = arith.index_cast %c5_i32_82 : i32 to index
    %c0_91 = arith.constant 0 : index
    %227 = vector.load %arg9[%226, %c0_91] : memref<8x128xf32, #tpu.memory_space<vmem>>, vector<1x128xf32>
    tpu.vector_store %arg9[%226, %c0_91], %225 {strides = array<i32>} : memref<8x128xf32, #tpu.memory_space<vmem>>, vector<1x128xf32>,
    %c6_i32_92 = arith.constant 6 : i32
    %c0_i32_93 = arith.constant 0 : i32
    %c0_i32_94 = arith.constant 0 : i32
    %228 = tpu.memref_slice %arg2[%c0_i32_93, %c0_i32_94] : memref<16x512xf32, #tpu.memory_space<any>> -> memref<1x512xf32, #tpu.memory_space<any>>
    %c0_i32_95 = arith.constant 0 : i32
    %229 = tpu.memref_slice %arg7[%c6_i32_92, %c0_i32_95] : memref<8x512xf32, #tpu.memory_space<vmem>> -> memref<1x512xf32, #tpu.memory_space<vmem>>
    %230 = tpu.memref_slice %arg8[%c6_i32_92] : memref<8x!tpu.dma_semaphore, #tpu.memory_space<semaphore_mem>> -> memref<1x!tpu.dma_semaphore, #tpu.memory_space<semaphore_mem>>
    %231 = tpu.memref_squeeze %230 : memref<1x!tpu.dma_semaphore, #tpu.memory_space<semaphore_mem>> -> memref<!tpu.dma_semaphore, #tpu.memory_space<semaphore_mem>>
    tpu.wait_dma2 semaphore(%231 : memref<!tpu.dma_semaphore, #tpu.memory_space<semaphore_mem>>) src(%228 : memref<1x512xf32, #tpu.memory_space<any>>) dst(%229 : memref<1x512xf32, #tpu.memory_space<vmem>>)
    %232 = arith.index_cast %c6_i32_92 : i32 to index
    %c0_96 = arith.constant 0 : index
    %233 = vector.load %arg7[%232, %c0_96] : memref<8x512xf32, #tpu.memory_space<vmem>>, vector<1x512xf32>
    %234 = arith.truncf %225 : vector<1x128xf32> to vector<1x128xbf16>
    %c0_97 = arith.constant 0 : index
    %c0_98 = arith.constant 0 : index
    %235 = vector.load %arg3[%c0_97, %c0_98] : memref<128x512xbf16, #tpu.memory_space<vmem>>, vector<128x512xbf16>
    %cst_99 = arith.constant dense<0.000000e+00> : vector<1x512xf32>
    %236 = tpu.matmul %234, %235, %cst_99 {dimension_numbers = #tpu.dot_dimension_numbers<[1], [0], [0], [1], [0, 0, 1, 1], [], []>} : vector<1x128xbf16>, vector<128x512xbf16>, vector<1x512xf32> -> vector<1x512xf32>
    %237 = arith.addf %233, %236 : vector<1x512xf32>
    %238 = arith.negf %237 : vector<1x512xf32>
    %239 = math.exp %238 : vector<1x512xf32>
    %cst_100 = arith.constant 1.000000e+00 : f32
    %240 = vector.broadcast %cst_100 : f32 to vector<1x512xf32>
    %241 = arith.addf %240, %239 : vector<1x512xf32>
    %242 = arith.divf %240, %241 : vector<1x512xf32>
    %243 = vector.extract_strided_slice %242 {offsets = [0, 0], sizes = [1, 128], strides = [1, 1]} : vector<1x512xf32> to vector<1x128xf32>
    %244 = vector.extract_strided_slice %242 {offsets = [0, 128], sizes = [1, 128], strides = [1, 1]} : vector<1x512xf32> to vector<1x128xf32>
    %245 = vector.extract_strided_slice %242 {offsets = [0, 384], sizes = [1, 128], strides = [1, 1]} : vector<1x512xf32> to vector<1x128xf32>
    %246 = vector.extract_strided_slice %237 {offsets = [0, 256], sizes = [1, 128], strides = [1, 1]} : vector<1x512xf32> to vector<1x128xf32>
    %247 = math.tanh %246 : vector<1x128xf32>
    %248 = arith.mulf %244, %223 : vector<1x128xf32>
    %249 = arith.mulf %243, %247 : vector<1x128xf32>
    %250 = arith.addf %248, %249 : vector<1x128xf32>
    %251 = math.tanh %250 : vector<1x128xf32>
    %252 = arith.mulf %245, %251 : vector<1x128xf32>
    %253 = arith.index_cast %c6_i32_92 : i32 to index
    %c0_101 = arith.constant 0 : index
    %254 = vector.load %arg9[%253, %c0_101] : memref<8x128xf32, #tpu.memory_space<vmem>>, vector<1x128xf32>
    tpu.vector_store %arg9[%253, %c0_101], %252 {strides = array<i32>} : memref<8x128xf32, #tpu.memory_space<vmem>>, vector<1x128xf32>,
    %c7_i32_102 = arith.constant 7 : i32
    %c0_i32_103 = arith.constant 0 : i32
    %c0_i32_104 = arith.constant 0 : i32
    %255 = tpu.memref_slice %arg2[%c0_i32_103, %c0_i32_104] : memref<16x512xf32, #tpu.memory_space<any>> -> memref<1x512xf32, #tpu.memory_space<any>>
    %c0_i32_105 = arith.constant 0 : i32
    %256 = tpu.memref_slice %arg7[%c7_i32_102, %c0_i32_105] : memref<8x512xf32, #tpu.memory_space<vmem>> -> memref<1x512xf32, #tpu.memory_space<vmem>>
    %257 = tpu.memref_slice %arg8[%c7_i32_102] : memref<8x!tpu.dma_semaphore, #tpu.memory_space<semaphore_mem>> -> memref<1x!tpu.dma_semaphore, #tpu.memory_space<semaphore_mem>>
    %258 = tpu.memref_squeeze %257 : memref<1x!tpu.dma_semaphore, #tpu.memory_space<semaphore_mem>> -> memref<!tpu.dma_semaphore, #tpu.memory_space<semaphore_mem>>
    tpu.wait_dma2 semaphore(%258 : memref<!tpu.dma_semaphore, #tpu.memory_space<semaphore_mem>>) src(%255 : memref<1x512xf32, #tpu.memory_space<any>>) dst(%256 : memref<1x512xf32, #tpu.memory_space<vmem>>)
    %259 = arith.index_cast %c7_i32_102 : i32 to index
    %c0_106 = arith.constant 0 : index
    %260 = vector.load %arg7[%259, %c0_106] : memref<8x512xf32, #tpu.memory_space<vmem>>, vector<1x512xf32>
    %261 = arith.truncf %252 : vector<1x128xf32> to vector<1x128xbf16>
    %c0_107 = arith.constant 0 : index
    %c0_108 = arith.constant 0 : index
    %262 = vector.load %arg3[%c0_107, %c0_108] : memref<128x512xbf16, #tpu.memory_space<vmem>>, vector<128x512xbf16>
    %cst_109 = arith.constant dense<0.000000e+00> : vector<1x512xf32>
    %263 = tpu.matmul %261, %262, %cst_109 {dimension_numbers = #tpu.dot_dimension_numbers<[1], [0], [0], [1], [0, 0, 1, 1], [], []>} : vector<1x128xbf16>, vector<128x512xbf16>, vector<1x512xf32> -> vector<1x512xf32>
    %264 = arith.addf %260, %263 : vector<1x512xf32>
    %265 = arith.negf %264 : vector<1x512xf32>
    %266 = math.exp %265 : vector<1x512xf32>
    %cst_110 = arith.constant 1.000000e+00 : f32
    %267 = vector.broadcast %cst_110 : f32 to vector<1x512xf32>
    %268 = arith.addf %267, %266 : vector<1x512xf32>
    %269 = arith.divf %267, %268 : vector<1x512xf32>
    %270 = vector.extract_strided_slice %269 {offsets = [0, 0], sizes = [1, 128], strides = [1, 1]} : vector<1x512xf32> to vector<1x128xf32>
    %271 = vector.extract_strided_slice %269 {offsets = [0, 128], sizes = [1, 128], strides = [1, 1]} : vector<1x512xf32> to vector<1x128xf32>
    %272 = vector.extract_strided_slice %269 {offsets = [0, 384], sizes = [1, 128], strides = [1, 1]} : vector<1x512xf32> to vector<1x128xf32>
    %273 = vector.extract_strided_slice %264 {offsets = [0, 256], sizes = [1, 128], strides = [1, 1]} : vector<1x512xf32> to vector<1x128xf32>
    %274 = math.tanh %273 : vector<1x128xf32>
    %275 = arith.mulf %271, %250 : vector<1x128xf32>
    %276 = arith.mulf %270, %274 : vector<1x128xf32>
    %277 = arith.addf %275, %276 : vector<1x128xf32>
    %278 = math.tanh %277 : vector<1x128xf32>
    %279 = arith.mulf %272, %278 : vector<1x128xf32>
    %280 = arith.index_cast %c7_i32_102 : i32 to index
    %c0_111 = arith.constant 0 : index
    %281 = vector.load %arg9[%280, %c0_111] : memref<8x128xf32, #tpu.memory_space<vmem>>, vector<1x128xf32>
    tpu.vector_store %arg9[%280, %c0_111], %279 {strides = array<i32>} : memref<8x128xf32, #tpu.memory_space<vmem>>, vector<1x128xf32>,
    %c8_i32_112 = arith.constant 8 : i32
    %c0_113 = arith.constant 0 : index
    %c0_114 = arith.constant 0 : index
    %282 = vector.load %arg9[%c0_113, %c0_114] : memref<8x128xf32, #tpu.memory_space<vmem>>, vector<8x128xf32>
    %283 = arith.truncf %282 : vector<8x128xf32> to vector<8x128xbf16>
    %c0_115 = arith.constant 0 : index
    %c0_116 = arith.constant 0 : index
    %284 = vector.load %arg4[%c0_115, %c0_116] : memref<128x128xbf16, #tpu.memory_space<vmem>>, vector<128x128xbf16>
    %cst_117 = arith.constant dense<0.000000e+00> : vector<8x128xf32>
    %285 = tpu.matmul %283, %284, %cst_117 {dimension_numbers = #tpu.dot_dimension_numbers<[1], [0], [0], [1], [0, 0, 1, 1], [], []>} : vector<8x128xbf16>, vector<128x128xbf16>, vector<8x128xf32> -> vector<8x128xf32>
    %c0_118 = arith.constant 0 : index
    %c0_119 = arith.constant 0 : index
    %286 = vector.load %arg5[%c0_118, %c0_119] : memref<1x128xf32, #tpu.memory_space<vmem>>, vector<1x128xf32>
    %287 = vector.broadcast %286 : vector<1x128xf32> to vector<8x128xf32>
    %288 = arith.addf %285, %287 : vector<8x128xf32>
    %cst_120 = arith.constant dense<0xFF800000> : vector<8xf32>
    %289 = vector.multi_reduction <maximumf>, %288, %cst_120 [1] : vector<8x128xf32> to vector<8xf32>
    %290 = vector.shape_cast %289 : vector<8xf32> to vector<8x1xf32>
    %291 = vector.broadcast %290 : vector<8x1xf32> to vector<8x128xf32>
    %292 = arith.subf %288, %291 : vector<8x128xf32>
    %293 = math.exp %292 : vector<8x128xf32>
    %cst_121 = arith.constant dense<0.000000e+00> : vector<8xf32>
    %294 = vector.multi_reduction <add>, %293, %cst_121 [1] : vector<8x128xf32> to vector<8xf32>
    %295 = vector.shape_cast %294 : vector<8xf32> to vector<8x1xf32>
    %296 = math.log %295 : vector<8x1xf32>
    %297 = arith.addf %290, %296 : vector<8x1xf32>
    %298 = vector.broadcast %297 : vector<8x1xf32> to vector<8x128xf32>
    %299 = arith.subf %288, %298 : vector<8x128xf32>
    %c0_122 = arith.constant 0 : index
    %c0_123 = arith.constant 0 : index
    %300 = vector.load %arg6[%c0_122, %c0_123] : memref<8x128xf32, #tpu.memory_space<vmem>>, vector<8x128xf32>
    tpu.vector_store %arg6[%c0_122, %c0_123], %299 {strides = array<i32>} : memref<8x128xf32, #tpu.memory_space<vmem>>, vector<8x128xf32>,
    return
  }
  func.func @transform_1(%arg0: i32, %arg1: memref<8xi32, #tpu.memory_space<smem>>) -> (i32, i32) {
    %c0_i32 = arith.constant 0 : i32
    %c0_i32_0 = arith.constant 0 : i32
    %c0_i32_1 = arith.constant 0 : i32
    return %c0_i32, %c0_i32_0 : i32, i32
  }
  func.func @transform_2(%arg0: i32, %arg1: memref<8xi32, #tpu.memory_space<smem>>) -> (i32, i32) {
    %c0_i32 = arith.constant 0 : i32
    %c0_i32_0 = arith.constant 0 : i32
    %c0_i32_1 = arith.constant 0 : i32
    return %c0_i32, %c0_i32_0 : i32, i32
  }
  func.func @transform_3(%arg0: i32, %arg1: memref<8xi32, #tpu.memory_space<smem>>) -> (i32, i32) {
    %c0_i32 = arith.constant 0 : i32
    %c0_i32_0 = arith.constant 0 : i32
    %c0_i32_1 = arith.constant 0 : i32
    return %c0_i32, %c0_i32_0 : i32, i32
  }
  func.func @transform_4(%arg0: i32, %arg1: memref<8xi32, #tpu.memory_space<smem>>) -> (i32, i32) {
    %c0_i32 = arith.constant 0 : i32
    %c0_i32_0 = arith.constant 0 : i32
    %c0_i32_1 = arith.constant 0 : i32
    return %c0_i32, %c0_i32_0 : i32, i32
  }
}

</mosaic_0001>

<bundles_post_ra>
// kernel: lstm_tagger_forward.1
= control target key start
LH: loop header
LB: loop body
LE: loop exit
PB: predicated region body
PF: predicated region fallthrough
CT: control target
= control target key end

     0   :  { %s4110_s18 = smov [#allocation6]   ;;  %s4441_s0 = inlined_call_operand.hbm [shape: s32[8], index: 0, kind: input, shape index: {}]   ;;  %s4442_s1 = inlined_call_operand.hbm [shape: f32[16,512], index: 1, kind: input, shape index: {}]   ;;  %s4443_s2 = inlined_call_operand.hbm [shape: bf16[128,512], index: 2, kind: input, shape index: {}]   ;;  %s4444_s3 = inlined_call_operand.hbm [shape: bf16[128,128], index: 3, kind: input, shape index: {}]   ;;  %s4445_s4 = inlined_call_operand.vmem [shape: f32[1,128], index: 4, kind: input, shape index: {}]   ;;  %s4446_s5 = inlined_call_operand.hbm [shape: f32[8,128], index: 5, kind: output, shape index: {}]  }
   0x1   :  { %11 = dma.hbm_to_smem %s4441_s0, 16, %s4110_s18, [#allocation5] }
   0x2   :  { %4086 = dma.done.wait [#allocation5], 16 }
   0x3   :  { %4087 = vsyncadd [#allocation5], 4294967280 }
   0x4   :  { %13 = sfence }
   0x5   :  { %14 = vsyncpa [#allocation8], 0 }
   0x6   :  { %15 = vsyncpa [#allocation11], 0 }
   0x7   :  { %16 = vsyncpa [#allocation9], 0  ;;  %s4111_s21 = smov [#allocation7]  }
   0x8   :  { %s22_s22 = sshll.u32 %s4111_s21, 4  ;;  %s23_s22 = int_to_ptr.vmem [resolvable:$true] %s22_s22 }
   0x9   :  { %s3858_s23 = scalar_lea.vmem %s23_s22, 4096  ;;  %p3863_p1 = scmp.lt.s32.totalorder %s23_s22, %s23_s22 }
   0xa   :  { %p3859_p0 = scmp.ne.s32.totalorder %s23_s22, %s3858_s23  ;;  %p3864_p2 = scmp.lt.s32.totalorder %s3858_s23, %s3858_s23 }
   0xc   :  { %p3865_p3 = por %p3864_p2, %p3863_p1 }
   0xe   :  { %p3866_p4 = pnand %p3865_p3, %p3859_p0 }
  0x10   :  { %3869 = shalt.err (!%p3866_p4)
}
  0x11   :  { %s4112_s24 = smov 256   ;;  %s4113_s25 = smov 16  }
  0x12   :  { %28 = dma.hbm_to_vmem [thread:$0]  %s4443_s2, 4096, %s23_s22, [#allocation8], %s4112_s24, %s4112_s24, %s4113_s25  }
  0x13   :  { %s4114_s27 = smov [#allocation10]  }
  0x14   :  { %s34_s28 = sshll.u32 %s4114_s27, 4  ;;  %s35_s28 = int_to_ptr.vmem [resolvable:$true] %s34_s28 }
  0x15   :  { %s3878_s29 = scalar_lea.vmem %s35_s28, 1024  ;;  %p3883_p6 = scmp.lt.s32.totalorder %s35_s28, %s35_s28 }
  0x16   :  { %p3879_p5 = scmp.ne.s32.totalorder %s35_s28, %s3878_s29  ;;  %p3884_p7 = scmp.lt.s32.totalorder %s3878_s29, %s3878_s29 }
  0x18   :  { %p3885_p8 = por %p3884_p7, %p3883_p6 }
  0x1a   :  { %p3886_p9 = pnand %p3885_p8, %p3879_p5 }
  0x1c   :  { %3889 = shalt.err (!%p3886_p9)
}
  0x1d   :  { %s4115_s30 = smov 64   ;;  %s4116_s6 = smov 4  }
  0x1e   :  { %40 = dma.hbm_to_vmem [thread:$0]  %s4444_s3, 1024, %s35_s28, [#allocation11], %s4115_s30, %s4115_s30, %s4116_s6  }
  0x1f   :  { %4088 = dma.done.wait [#allocation8], 4096  }
  0x20   :  { %4089 = vsyncadd [#allocation8], 4294963200 }
  0x21   :  { %4090 = dma.done.wait [#allocation11], 1024  }
  0x22   :  { %4091 = vsyncadd [#allocation11], 4294966272  ;;  %s50_s2 = sld [smem:[#allocation6]]  ;;  %s4117_s9 = smov [#allocation2]  }
  0x23   :  { %s58_s10 = sshll.u32 %s4117_s9, 4  ;;  %s4173_s11 = sld [smem:[#allocation6 + $0x1]]  ;;  %s4171_s10 = int_to_ptr.vmem [resolvable:$true] %s58_s10 }
  0x24   :  { %s4118_s12 = smov [#allocation2 + $0x1]   ;;  %s4175_s14 = sld [smem:[#allocation6 + $0x2]] }
  0x25   :  { %s72_s13 = sshll.u32 %s4118_s12, 4  ;;  %s4119_s3 = smov [#allocation2 + $0x2]   ;;  %s4177_s13 = int_to_ptr.vmem [resolvable:$true] %s72_s13 }
  0x26   :  { %s86_s15 = sshll.u32 %s4119_s3, 4  ;;  %s4179_s16 = sld [smem:[#allocation6 + $0x3]]  ;;  %s4181_s15 = int_to_ptr.vmem [resolvable:$true] %s86_s15 }
  0x27   :  { %s4191_s30 = scalar_lea.hbm %s4442_s1, 1024 }
  0x28   :  { %s51_s17 = sshrl.u32 %s50_s2, 3  ;;  %s52_s18 = sand.u32 7, %s50_s2  }
  0x29   :  { %s3027_s19 = sshll.u32 %s51_s17, 5  ;;  %s63_s21 = sshrl.u32 %s4173_s11, 3 }
  0x2a   :  { %s54_s20 = sadd.s32 %s3027_s19, %s52_s18  ;;  %s64_s23 = sand.u32 7, %s4173_s11  }
  0x2b   :  { %s3028_s22 = sshll.u32 %s54_s20, 4  ;;  %s3030_s0 = sshll.u32 %s63_s21, 5 }
  0x2c   :  { %s56_s26 = scalar_lea.hbm %s4442_s1, %s3028_s22 }
  0x2d   :  { %s3890_s27 = scalar_lea.hbm %s56_s26, 64  ;;  %p3893_p11 = scmp.lt.s32.totalorder %s56_s26, %s4442_s1 }
  0x2e   :  { %p3891_p10 = scmp.ne.s32.totalorder %s56_s26, %s3890_s27  ;;  %p3894_p12 = scmp.lt.s32.totalorder %s4191_s30, %s3890_s27 }
  0x30   :  { %p3895_p13 = por %p3894_p12, %p3893_p11 }
  0x32   :  { %p3896_p0 = pnand %p3895_p13, %p3891_p10 }
  0x34   :  { %3899 = shalt.err (!%p3896_p0)  }
  0x35   :  { %s3900_s8 = scalar_lea.vmem %s4171_s10, 64  ;;  %s4200_s2 = scalar_lea.vmem %s4171_s10, 512 }
  0x36   :  { %p3901_p1 = scmp.ne.s32.totalorder %s4171_s10, %s3900_s8  ;;  %p3905_p2 = scmp.lt.s32.totalorder %s4171_s10, %s4171_s10 }
  0x37   :  { %p3906_p3 = scmp.lt.s32.totalorder %s4200_s2, %s3900_s8 }
  0x39   :  { %p3907_p4 = por %p3906_p3, %p3905_p2 }
  0x3b   :  { %p3908_p5 = pnand %p3907_p4, %p3901_p1 }
  0x3d   :  { %3911 = shalt.err (!%p3908_p5)  }
  0x3e   :  { %s4120_s9 = smov 128   ;;  %s4121_s11 = smov 1  }
  0x3f   :  { %61 = dma.hbm_to_vmem [thread:$0]  %s56_s26, 64, %s4171_s10, [#allocation3], %s4120_s9, %s4120_s9, %s4121_s11 }
  0x40   :  { %s66_s12 = sadd.s32 %s3030_s0, %s64_s23  ;;  %s77_s3 = sshrl.u32 %s4175_s14, 3 }
  0x41   :  { %s3031_s17 = sshll.u32 %s66_s12, 4  ;;  %s78_s18 = sand.u32 7, %s4175_s14  }
  0x42   :  { %s68_s21 = scalar_lea.hbm %s4442_s1, %s3031_s17  ;;  %s3033_s22 = sshll.u32 %s77_s3, 5 }
  0x43   :  { %s3912_s24 = scalar_lea.hbm %s68_s21, 64  ;;  %p3915_p7 = scmp.lt.s32.totalorder %s68_s21, %s4442_s1 }
  0x44   :  { %p3913_p6 = scmp.ne.s32.totalorder %s68_s21, %s3912_s24  ;;  %p3916_p8 = scmp.lt.s32.totalorder %s4191_s30, %s3912_s24 }
  0x46   :  { %p3917_p9 = por %p3916_p8, %p3915_p7 }
  0x48   :  { %p3918_p10 = pnand %p3917_p9, %p3913_p6 }
  0x4a   :  { %3921 = shalt.err (!%p3918_p10)  }
  0x4b   :  { %s3922_s14 = scalar_lea.vmem %s4177_s13, 64  ;;  %p3927_p12 = scmp.lt.s32.totalorder %s4177_s13, %s4171_s10 }
  0x4c   :  { %p3923_p11 = scmp.ne.s32.totalorder %s4177_s13, %s3922_s14  ;;  %p3928_p13 = scmp.lt.s32.totalorder %s4200_s2, %s3922_s14 }
  0x4e   :  { %p3929_p0 = por %p3928_p13, %p3927_p12 }
  0x50   :  { %p3930_p1 = pnand %p3929_p0, %p3923_p11 }
  0x52   :  { %3933 = shalt.err (!%p3930_p1)  }
  0x53   :  { %75 = dma.hbm_to_vmem [thread:$0]  %s68_s21, 64, %s4177_s13, [#allocation3 + $0x1], %s4120_s9, %s4120_s9, %s4121_s11 }
  0x54   :  { %s80_s23 = sadd.s32 %s3033_s22, %s78_s18  ;;  %s91_s26 = sshrl.u32 %s4179_s16, 3 }
  0x55   :  { %s3034_s0 = sshll.u32 %s80_s23, 4  ;;  %s92_s28 = sand.u32 7, %s4179_s16  }
  0x56   :  { %s82_s7 = scalar_lea.hbm %s4442_s1, %s3034_s0  ;;  %s3036_s8 = sshll.u32 %s91_s26, 5 }
  0x57   :  { %s3934_s12 = scalar_lea.hbm %s82_s7, 64  ;;  %p3937_p3 = scmp.lt.s32.totalorder %s82_s7, %s4442_s1 }
  0x58   :  { %p3935_p2 = scmp.ne.s32.totalorder %s82_s7, %s3934_s12  ;;  %p3938_p4 = scmp.lt.s32.totalorder %s4191_s30, %s3934_s12 }
  0x5a   :  { %p3939_p5 = por %p3938_p4, %p3937_p3 }
  0x5c   :  { %p3940_p6 = pnand %p3939_p5, %p3935_p2 }
  0x5e   :  { %3943 = shalt.err (!%p3940_p6)  }
  0x5f   :  { %s3944_s13 = scalar_lea.vmem %s4181_s15, 64  ;;  %p3949_p8 = scmp.lt.s32.totalorder %s4181_s15, %s4171_s10 }
  0x60   :  { %p3945_p7 = scmp.ne.s32.totalorder %s4181_s15, %s3944_s13  ;;  %p3950_p9 = scmp.lt.s32.totalorder %s4200_s2, %s3944_s13 }
  0x62   :  { %p3951_p10 = por %p3950_p9, %p3949_p8 }
  0x64   :  { %p3952_p11 = pnand %p3951_p10, %p3945_p7 }
  0x66   :  { %3955 = shalt.err (!%p3952_p11)  }
  0x67   :  { %89 = dma.hbm_to_vmem [thread:$0]  %s82_s7, 64, %s4181_s15, [#allocation3 + $0x2], %s4120_s9, %s4120_s9, %s4121_s11 }
  0x68   :  { %s94_s16 = sadd.s32 %s3036_s8, %s92_s28  ;;  %s4122_s19 = smov [#allocation2 + $0x3]  }
  0x69   :  { %s3037_s18 = sshll.u32 %s94_s16, 4  ;;  %s100_s20 = sshll.u32 %s4122_s19, 4  ;;  %s101_s20 = int_to_ptr.vmem [resolvable:$true] %s100_s20 }
  0x6a   :  { %s96_s24 = scalar_lea.hbm %s4442_s1, %s3037_s18 }
  0x6b   :  { %s3956_s25 = scalar_lea.hbm %s96_s24, 64  ;;  %p3959_p13 = scmp.lt.s32.totalorder %s96_s24, %s4442_s1 }
  0x6c   :  { %p3957_p12 = scmp.ne.s32.totalorder %s96_s24, %s3956_s25  ;;  %p3960_p0 = scmp.lt.s32.totalorder %s4191_s30, %s3956_s25 }
  0x6e   :  { %p3961_p1 = por %p3960_p0, %p3959_p13 }
  0x70   :  { %p3962_p2 = pnand %p3961_p1, %p3957_p12 }
  0x72   :  { %3965 = shalt.err (!%p3962_p2)  }
  0x73   :  { %s3966_s15 = scalar_lea.vmem %s101_s20, 64  ;;  %p3971_p4 = scmp.lt.s32.totalorder %s101_s20, %s4171_s10 }
  0x74   :  { %p3967_p3 = scmp.ne.s32.totalorder %s101_s20, %s3966_s15  ;;  %p3972_p5 = scmp.lt.s32.totalorder %s4200_s2, %s3966_s15 }
  0x76   :  { %p3973_p6 = por %p3972_p5, %p3971_p4 }
  0x78   :  { %p3974_p7 = pnand %p3973_p6, %p3967_p3 }
  0x7a   :  { %3977 = shalt.err (!%p3974_p7)  }
  0x7b   :  { %103 = dma.hbm_to_vmem [thread:$0]  %s96_s24, 64, %s101_s20, [#allocation3 + $0x3], %s4120_s9, %s4120_s9, %s4121_s11 }
  0x7c   :  { %s3038_s23 = sld [smem:[#allocation6 + $0x4]]  ;;  %s4123_s26 = smov [#allocation2 + $0x4]  }
  0x7d   :  { %s114_s0 = sshll.u32 %s4123_s26, 4  ;;  %s3041_s28 = sld [smem:[#allocation6 + $0x5]]  ;;  %s4257_s0 = int_to_ptr.vmem [resolvable:$true] %s114_s0 }
  0x7e   :  { %s4124_s29 = smov [#allocation2 + $0x5]   ;;  %s4259_s7 = sld [smem:[#allocation6 + $0x6]] }
  0x7f   :  { %s128_s6 = sshll.u32 %s4124_s29, 4  ;;  %s4125_s8 = smov [#allocation2 + $0x6]   ;;  %s4261_s6 = int_to_ptr.vmem [resolvable:$true] %s128_s6 }
  0x80   :  { %s4263_s12 = sshll.u32 %s4125_s8, 4  ;;  %s4265_s3 = sld [smem:[#allocation6 + $0x7]]  ;;  %s143_s12 = int_to_ptr.vmem [resolvable:$true] %s4263_s12 }
  0x82   :  { %s105_s17 = sshrl.u32 %s3038_s23, 3  ;;  %s106_s13 = sand.u32 7, %s3038_s23  }
  0x83   :  { %s3039_s16 = sshll.u32 %s105_s17, 5  ;;  %s119_s18 = sshrl.u32 %s3041_s28, 3 }
  0x84   :  { %s108_s19 = sadd.s32 %s3039_s16, %s106_s13  ;;  %s120_s20 = sand.u32 7, %s3041_s28  }
  0x85   :  { %s3040_s21 = sshll.u32 %s108_s19, 4  ;;  %s3042_s22 = sshll.u32 %s119_s18, 5 }
  0x86   :  { %s110_s27 = scalar_lea.hbm %s4442_s1, %s3040_s21  ;;  %s122_s14 = sadd.s32 %s3042_s22, %s120_s20 }
  0x87   :  { %s3978_s15 = scalar_lea.hbm %s110_s27, 64  ;;  %p3981_p9 = scmp.lt.s32.totalorder %s110_s27, %s4442_s1 }
  0x88   :  { %p3979_p8 = scmp.ne.s32.totalorder %s110_s27, %s3978_s15  ;;  %p3982_p10 = scmp.lt.s32.totalorder %s4191_s30, %s3978_s15 }
  0x8a   :  { %p3983_p11 = por %p3982_p10, %p3981_p9 }
  0x8c   :  { %p3984_p12 = pnand %p3983_p11, %p3979_p8 }
  0x8e   :  { %3987 = shalt.err (!%p3984_p12)  }
  0x8f   :  { %s3988_s23 = scalar_lea.vmem %s4257_s0, 64  ;;  %p3993_p0 = scmp.lt.s32.totalorder %s4257_s0, %s4171_s10 }
  0x90   :  { %p3989_p13 = scmp.ne.s32.totalorder %s4257_s0, %s3988_s23  ;;  %p3994_p1 = scmp.lt.s32.totalorder %s4200_s2, %s3988_s23 }
  0x92   :  { %p3995_p2 = por %p3994_p1, %p3993_p0 }
  0x94   :  { %p3996_p3 = pnand %p3995_p2, %p3989_p13 }
  0x96   :  { %3999 = shalt.err (!%p3996_p3)  }
  0x97   :  { %117 = dma.hbm_to_vmem [thread:$0]  %s110_s27, 64, %s4257_s0, [#allocation3 + $0x4], %s4120_s9, %s4120_s9, %s4121_s11 }
  0x98   :  { %s3043_s28 = sshll.u32 %s122_s14, 4  ;;  %s133_s8 = sshrl.u32 %s4259_s7, 3 }
  0x99   :  { %s124_s16 = scalar_lea.hbm %s4442_s1, %s3043_s28  ;;  %s134_s18 = sand.u32 7, %s4259_s7  }
  0x9a   :  { %s4000_s19 = scalar_lea.hbm %s124_s16, 64  ;;  %p4003_p5 = scmp.lt.s32.totalorder %s124_s16, %s4442_s1 }
  0x9b   :  { %p4001_p4 = scmp.ne.s32.totalorder %s124_s16, %s4000_s19  ;;  %p4004_p6 = scmp.lt.s32.totalorder %s4191_s30, %s4000_s19 }
  0x9d   :  { %p4005_p7 = por %p4004_p6, %p4003_p5 }
  0x9f   :  { %p4006_p8 = pnand %p4005_p7, %p4001_p4 }
  0xa1   :  { %4009 = shalt.err (!%p4006_p8)  }
  0xa2   :  { %s4010_s0 = scalar_lea.vmem %s4261_s6, 64  ;;  %p4015_p10 = scmp.lt.s32.totalorder %s4261_s6, %s4171_s10 }
  0xa3   :  { %p4011_p9 = scmp.ne.s32.totalorder %s4261_s6, %s4010_s0  ;;  %p4016_p11 = scmp.lt.s32.totalorder %s4200_s2, %s4010_s0 }
  0xa5   :  { %p4017_p12 = por %p4016_p11, %p4015_p10 }
  0xa7   :  { %p4018_p13 = pnand %p4017_p12, %p4011_p9 }
  0xa9   :  { %4021 = shalt.err (!%p4018_p13)  }
  0xaa   :  { %131 = dma.hbm_to_vmem [thread:$0]  %s124_s16, 64, %s4261_s6, [#allocation3 + $0x5], %s4120_s9, %s4120_s9, %s4121_s11 }
  0xab   :  { %s3045_s7 = sshll.u32 %s133_s8, 5  ;;  %s147_s24 = sshrl.u32 %s4265_s3, 3 }
  0xac   :  { %s136_s22 = sadd.s32 %s3045_s7, %s134_s18  ;;  %s148_s27 = sand.u32 7, %s4265_s3  }
  0xad   :  { %s3046_s25 = sshll.u32 %s136_s22, 4  ;;  %s3048_s29 = sshll.u32 %s147_s24, 5 }
  0xae   :  { %s138_s26 = scalar_lea.hbm %s4442_s1, %s3046_s25 }
  0xaf   :  { %s4022_s23 = scalar_lea.hbm %s138_s26, 64  ;;  %p4025_p1 = scmp.lt.s32.totalorder %s138_s26, %s4442_s1 }
  0xb0   :  { %p4023_p0 = scmp.ne.s32.totalorder %s138_s26, %s4022_s23  ;;  %p4026_p2 = scmp.lt.s32.totalorder %s4191_s30, %s4022_s23 }
  0xb2   :  { %p4027_p3 = por %p4026_p2, %p4025_p1 }
  0xb4   :  { %p4028_p4 = pnand %p4027_p3, %p4023_p0 }
  0xb6   :  { %4031 = shalt.err (!%p4028_p4)  }
  0xb7   :  { %s4032_s6 = scalar_lea.vmem %s143_s12, 64  ;;  %p4037_p6 = scmp.lt.s32.totalorder %s143_s12, %s4171_s10 }
  0xb8   :  { %p4033_p5 = scmp.ne.s32.totalorder %s143_s12, %s4032_s6  ;;  %p4038_p7 = scmp.lt.s32.totalorder %s4200_s2, %s4032_s6 }
  0xba   :  { %p4039_p8 = por %p4038_p7, %p4037_p6 }
  0xbc   :  { %p4040_p9 = pnand %p4039_p8, %p4033_p5 }
  0xbe   :  { %4043 = shalt.err (!%p4040_p9)  }
  0xbf   :  { %145 = dma.hbm_to_vmem [thread:$0]  %s138_s26, 64, %s143_s12, [#allocation3 + $0x6], %s4120_s9, %s4120_s9, %s4121_s11 }
  0xc0   :  { %s150_s3 = sadd.s32 %s3048_s29, %s148_s27  ;;  %s4126_s13 = smov [#allocation2 + $0x7]  }
  0xc1   :  { %s3049_s8 = sshll.u32 %s150_s3, 4  ;;  %s156_s16 = sshll.u32 %s4126_s13, 4  ;;  %s157_s16 = int_to_ptr.vmem [resolvable:$true] %s156_s16 }
  0xc2   :  { %s152_s20 = scalar_lea.hbm %s4442_s1, %s3049_s8 }
  0xc3   :  { %s4044_s21 = scalar_lea.hbm %s152_s20, 64  ;;  %p4047_p11 = scmp.lt.s32.totalorder %s152_s20, %s4442_s1 }
  0xc4   :  { %p4045_p10 = scmp.ne.s32.totalorder %s152_s20, %s4044_s21  ;;  %p4048_p12 = scmp.lt.s32.totalorder %s4191_s30, %s4044_s21 }
  0xc6   :  { %p4049_p13 = por %p4048_p12, %p4047_p11 }
  0xc8   :  { %p4050_p0 = pnand %p4049_p13, %p4045_p10 }
  0xca   :  { %4053 = shalt.err (!%p4050_p0)  }
  0xcb   :  { %s4054_s12 = scalar_lea.vmem %s157_s16, 64  ;;  %p4059_p2 = scmp.lt.s32.totalorder %s157_s16, %s4171_s10 }
  0xcc   :  { %p4055_p1 = scmp.ne.s32.totalorder %s157_s16, %s4054_s12  ;;  %p4060_p3 = scmp.lt.s32.totalorder %s4200_s2, %s4054_s12 }
  0xce   :  { %p4061_p4 = por %p4060_p3, %p4059_p2 }
  0xd0   :  { %p4062_p5 = pnand %p4061_p4, %p4055_p1 }
  0xd2   :  { %4065 = shalt.err (!%p4062_p5)  }
  0xd3   :  { %159 = dma.hbm_to_vmem [thread:$0]  %s152_s20, 64, %s157_s16, [#allocation3 + $0x7], %s4120_s9, %s4120_s9, %s4121_s11 }
  0xd4   :  { %4092 = dma.done.wait [#allocation3], 64 }
  0xd5   :  { %4093 = vsyncadd [#allocation3], 4294967232  ;;  %v4127_v0 = vmov 0   ;;  %v3382_v1 = vld [vmem:[#allocation7 + $0xe4] ss:$16 sps:$4 sm:$0xff]   ;;  %v447_v35 = vlaneseq }
  0xd6   :  { %388 = vmatprep.mubr.bf16.mxu0 %v4127_v0  ;;  %429 = vmatprep.mubr.bf16.mxu1 %v4127_v0  ;;  %v3384_v2 = vld [vmem:[#allocation7 + $0xec] ss:$16 sps:$4 sm:$0xff]   ;;  %v3386_v3 = vld [vmem:[#allocation7 + $0xe0] ss:$16 sps:$4 sm:$0xff]   ;;  %v3387_v4 = vld [vmem:[#allocation7 + $0xe8] ss:$16 sps:$4 sm:$0xff]  }
  0xd7   :  { %356 = vmatprep.subr.bf16.mxu0 %v3382_v1  ;;  %397 = vmatprep.subr.bf16.mxu1 %v3384_v2  ;;  %v3388_v5 = vld [vmem:[#allocation7 + $0xc4] ss:$16 sps:$4 sm:$0xff]   ;;  %v3390_v6 = vld [vmem:[#allocation7 + $0xcc] ss:$16 sps:$4 sm:$0xff]   ;;  %v3392_v7 = vld [vmem:[#allocation7 + $0xc0] ss:$16 sps:$4 sm:$0xff]  }
  0xd8   :  { %357 = vmatpush1.bf16.msra.mxu0 %v3386_v3  ;;  %398 = vmatpush1.bf16.msra.mxu1 %v3387_v4  ;;  %v3393_v8 = vld [vmem:[#allocation7 + $0xc8] ss:$16 sps:$4 sm:$0xff]   ;;  %v3394_v9 = vld [vmem:[#allocation7 + $0xa4] ss:$16 sps:$4 sm:$0xff]   ;;  %v3396_v10 = vld [vmem:[#allocation7 + $0xac] ss:$16 sps:$4 sm:$0xff]  }
  0xd9   :  { %358 = vmatprep.subr.bf16.mxu0 %v3388_v5  ;;  %399 = vmatprep.subr.bf16.mxu1 %v3390_v6  ;;  %v3398_v11 = vld [vmem:[#allocation7 + $0xa0] ss:$16 sps:$4 sm:$0xff]   ;;  %v3399_v12 = vld [vmem:[#allocation7 + $0xa8] ss:$16 sps:$4 sm:$0xff]   ;;  %v3400_v13 = vld [vmem:[#allocation7 + $0x84] ss:$16 sps:$4 sm:$0xff]  }
  0xda   :  { %v3402_v14 = vld [vmem:[#allocation7 + $0x8c] ss:$16 sps:$4 sm:$0xff]   ;;  %v3404_v15 = vld [vmem:[#allocation7 + $0x80] ss:$16 sps:$4 sm:$0xff]   ;;  %v3405_v16 = vld [vmem:[#allocation7 + $0x88] ss:$16 sps:$4 sm:$0xff]  }
  0xdb   :  { %v3406_v17 = vld [vmem:[#allocation7 + $0x64] ss:$16 sps:$4 sm:$0xff]   ;;  %v3408_v18 = vld [vmem:[#allocation7 + $0x6c] ss:$16 sps:$4 sm:$0xff]   ;;  %v3410_v19 = vld [vmem:[#allocation7 + $0x60] ss:$16 sps:$4 sm:$0xff]  }
  0xdc   :  { %359 = vmatpush1.bf16.msra.mxu0 %v3392_v7  ;;  %400 = vmatpush1.bf16.msra.mxu1 %v3393_v8  ;;  %v3411_v20 = vld [vmem:[#allocation7 + $0x68] ss:$16 sps:$4 sm:$0xff]   ;;  %v3412_v21 = vld [vmem:[#allocation7 + $0x44] ss:$16 sps:$4 sm:$0xff]   ;;  %v3414_v22 = vld [vmem:[#allocation7 + $0x4c] ss:$16 sps:$4 sm:$0xff]  }
  0xdd   :  { %360 = vmatprep.subr.bf16.mxu0 %v3394_v9  ;;  %401 = vmatprep.subr.bf16.mxu1 %v3396_v10  ;;  %v3416_v23 = vld [vmem:[#allocation7 + $0x40] ss:$16 sps:$4 sm:$0xff]   ;;  %v3417_v24 = vld [vmem:[#allocation7 + $0x48] ss:$16 sps:$4 sm:$0xff]   ;;  %v3418_v25 = vld [vmem:[#allocation7 + $0x24] ss:$16 sps:$4 sm:$0xff]  }
  0xde   :  { %v3420_v26 = vld [vmem:[#allocation7 + $0x2c] ss:$16 sps:$4 sm:$0xff]   ;;  %v3422_v27 = vld [vmem:[#allocation7 + $0x20] ss:$16 sps:$4 sm:$0xff]   ;;  %v3423_v28 = vld [vmem:[#allocation7 + $0x28] ss:$16 sps:$4 sm:$0xff]  }
  0xdf   :  { %v3424_v29 = vld [vmem:[#allocation7 + $0x4] ss:$16 sps:$4 sm:$0xff]   ;;  %v3426_v30 = vld [vmem:[#allocation7 + $0xc] ss:$16 sps:$4 sm:$0xff]   ;;  %v3428_v31 = vld [vmem:[#allocation7] ss:$16 sps:$4 sm:$0xff]  }
  0xe0   :  { %361 = vmatpush1.bf16.msra.mxu0 %v3398_v11  ;;  %402 = vmatpush1.bf16.msra.mxu1 %v3399_v12  ;;  %v3429_v32 = vld [vmem:[#allocation7 + $0x8] ss:$16 sps:$4 sm:$0xff]   ;;  %v4128_v33 = vmov 1966171168   ;;  %v448_v37 = vshrl.u32 %v447_v35, 7 }
  0xe1   :  { %362 = vmatprep.subr.bf16.mxu0 %v3400_v13  ;;  %403 = vmatprep.subr.bf16.mxu1 %v3402_v14  ;;  %v445_v34 = vunpack.c.l.s4 %v4128_v33  ;;  %v163_v52 = vld [vmem:[#allocation2] ss:$8 sm:$0xf] }
  0xe3   :  { %v446_v36 = vunpack.c.0.s8 %v445_v34 }
  0xe4   :  { %363 = vmatpush1.bf16.msra.mxu0 %v3404_v15  ;;  %404 = vmatpush1.bf16.msra.mxu1 %v3405_v16 }
  0xe5   :  { %364 = vmatprep.subr.bf16.mxu0 %v3406_v17  ;;  %405 = vmatprep.subr.bf16.mxu1 %v3408_v18  ;;  %v4332_v40 = vsub.s32 %v446_v36, %v448_v37 }
  0xe8   :  { %365 = vmatpush1.bf16.msra.mxu0 %v3410_v19  ;;  %406 = vmatpush1.bf16.msra.mxu1 %v3411_v20 }
  0xe9   :  { %366 = vmatprep.subr.bf16.mxu0 %v3412_v21  ;;  %407 = vmatprep.subr.bf16.mxu1 %v3414_v22 }
  0xec   :  { %367 = vmatpush1.bf16.msra.mxu0 %v3416_v23  ;;  %408 = vmatpush1.bf16.msra.mxu1 %v3417_v24 }
  0xed   :  { %368 = vmatprep.subr.bf16.mxu0 %v3418_v25  ;;  %409 = vmatprep.subr.bf16.mxu1 %v3420_v26 }
  0xf0   :  { %369 = vmatpush1.bf16.msra.mxu0 %v3422_v27  ;;  %410 = vmatpush1.bf16.msra.mxu1 %v3423_v28 }
  0xf1   :  { %370 = vmatprep.subr.bf16.mxu0 %v3424_v29  ;;  %411 = vmatprep.subr.bf16.mxu1 %v3426_v30 }
  0xf4   :  { %371 = vmatpush1.bf16.msra.mxu0 %v3428_v31  ;;  %412 = vmatpush1.bf16.msra.mxu1 %v3429_v32 }
  0xf7   :  { %389 = vmatmul.mubr.bf16.vlgmr.msra.gmra.mxu0 %v4127_v0  ;;  %430 = vmatmul.mubr.bf16.vlgmr.msra.gmra.mxu1 %v4127_v0 }
 0x1b7   :  { %v390_v38 = vpop.f32.mrf.mxu0  ;;  %v431_v39 = vpop.f32.mrf.mxu1 }
 0x1b9   :  { %v392_v41 = vpop.f32.mrf.mxu0  ;;  %v433_v42 = vpop.f32.mrf.mxu1 }
 0x1ba   :  { %v442_v43 = vcombine.low %v390_v38, %v392_v41  ;;  %v443_v44 = vcombine.low %v431_v39, %v433_v42 }
 0x1bb   :  { %v394_v45 = vpop.f32.mrf.mxu0  ;;  %v435_v46 = vpop.f32.mrf.mxu1 }
 0x1bc   :  { %v450_v47 = vrot.slane %v442_v43, %v4332_v40  ;;  %v457_v48 = vrot.slane %v443_v44, %v4332_v40 }
 0x1bd   :  { %v395_v49 = vpop.f32.mrf.mxu0  ;;  %v436_v50 = vpop.f32.mrf.mxu1 }
 0x1be   :  { %v458_v51 = vcombine.low %v450_v47, %v457_v48 }
 0x1c0   :  { %v465_v53 = vrot.slane %v458_v51, %v4332_v40 }
 0x1c2   :  { %v467_v54 = vadd.f32 %v465_v53, %v163_v52 }
 0x1c4   :  { %v3082_v55 = vmul.f32 -1.442695, %v467_v54  ;;  %v475_v58 = vrot.slane %v467_v54, 2 }
 0x1c6   :  { %3430 = vpow2.f32 %v3082_v55 }
 0x1d3   :  { %v3431_v56 = vpop.eup %3430 }
 0x1d4   :  { %v471_v57 = vadd.f32 1.0, %v3431_v56 }
 0x1d6   :  { %3432 = vrcp.f32 %v471_v57 }
 0x1d7   :  { %3434 = vtanh.f32 %v475_v58 }
 0x1e3   :  { %v3433_v59 = vpop.eup %3432 }
 0x1e4   :  { %v479_v60 = vrot.slane %v3433_v59, 1  ;;  %v3435_v61 = vpop.eup %3434  ;;  %v485_v2 = vrot.slane %v3433_v59, 3 }
 0x1e5   :  { %v482_v63 = vmul.f32 %v3435_v61, %v3433_v59 }
 0x1e6   :  { %v481_v62 = vmul.f32 0.0, %v479_v60 }
 0x1e8   :  { %v4337_v1 = vadd.f32 %v482_v63, %v481_v62 }
 0x1ea   :  { %3436 = vtanh.f32 %v4337_v1 }
 0x1f7   :  { %v3437_v3 = vpop.eup %3436 }
 0x1f8   :  { %v4340_v4 = vmul.f32 %v3437_v3, %v485_v2 }
 0x1fa   :  { %488 = vst [vmem:[#allocation4] sm:$0x1] %v4340_v4 }
 0x1fb   :  { %4094 = dma.done.wait [#allocation3 + $0x1], 64 }
 0x1fc   :  { %4095 = vsyncadd [#allocation3 + $0x1], 4294967232  ;;  %718 = vmatprep.mubr.bf16.mxu0 %v4127_v0  ;;  %759 = vmatprep.mubr.bf16.mxu1 %v4127_v0  ;;  %v3438_v5 = vld [vmem:[#allocation7 + $0xe4] ss:$16 sps:$4 sm:$0xff]   ;;  %v3440_v6 = vld [vmem:[#allocation7 + $0xec] ss:$16 sps:$4 sm:$0xff]   ;;  %v493_v37 = vpack.c.bf16 %v4340_v4, %v4340_v4 }
 0x1fd   :  { %686 = vmatprep.subr.bf16.mxu0 %v3438_v5  ;;  %v3442_v7 = vld [vmem:[#allocation7 + $0xe0] ss:$16 sps:$4 sm:$0xff]   ;;  %v3443_v8 = vld [vmem:[#allocation7 + $0xe8] ss:$16 sps:$4 sm:$0xff]   ;;  %727 = vmatprep.subr.bf16.mxu1 %v3440_v6  ;;  %v3444_v9 = vld [vmem:[#allocation7 + $0xc4] ss:$16 sps:$4 sm:$0xff]  }
 0x1fe   :  { %687 = vmatpush1.bf16.msra.mxu0 %v3442_v7  ;;  %728 = vmatpush1.bf16.msra.mxu1 %v3443_v8  ;;  %v3446_v10 = vld [vmem:[#allocation7 + $0xcc] ss:$16 sps:$4 sm:$0xff]   ;;  %v3448_v11 = vld [vmem:[#allocation7 + $0xc0] ss:$16 sps:$4 sm:$0xff]   ;;  %v3449_v12 = vld [vmem:[#allocation7 + $0xc8] ss:$16 sps:$4 sm:$0xff]  }
 0x1ff   :  { %688 = vmatprep.subr.bf16.mxu0 %v3444_v9  ;;  %729 = vmatprep.subr.bf16.mxu1 %v3446_v10  ;;  %v3450_v13 = vld [vmem:[#allocation7 + $0xa4] ss:$16 sps:$4 sm:$0xff]   ;;  %v3452_v14 = vld [vmem:[#allocation7 + $0xac] ss:$16 sps:$4 sm:$0xff]   ;;  %v3454_v15 = vld [vmem:[#allocation7 + $0xa0] ss:$16 sps:$4 sm:$0xff]  }
 0x200   :  { %v3455_v16 = vld [vmem:[#allocation7 + $0xa8] ss:$16 sps:$4 sm:$0xff]   ;;  %v3456_v17 = vld [vmem:[#allocation7 + $0x84] ss:$16 sps:$4 sm:$0xff]   ;;  %v3458_v18 = vld [vmem:[#allocation7 + $0x8c] ss:$16 sps:$4 sm:$0xff]  }
 0x201   :  { %v3460_v19 = vld [vmem:[#allocation7 + $0x80] ss:$16 sps:$4 sm:$0xff]   ;;  %v3461_v20 = vld [vmem:[#allocation7 + $0x88] ss:$16 sps:$4 sm:$0xff]   ;;  %v3462_v21 = vld [vmem:[#allocation7 + $0x64] ss:$16 sps:$4 sm:$0xff]  }
 0x202   :  { %689 = vmatpush1.bf16.msra.mxu0 %v3448_v11  ;;  %730 = vmatpush1.bf16.msra.mxu1 %v3449_v12  ;;  %v3464_v22 = vld [vmem:[#allocation7 + $0x6c] ss:$16 sps:$4 sm:$0xff]   ;;  %v3466_v23 = vld [vmem:[#allocation7 + $0x60] ss:$16 sps:$4 sm:$0xff]   ;;  %v3467_v24 = vld [vmem:[#allocation7 + $0x68] ss:$16 sps:$4 sm:$0xff]  }
 0x203   :  { %690 = vmatprep.subr.bf16.mxu0 %v3450_v13  ;;  %731 = vmatprep.subr.bf16.mxu1 %v3452_v14  ;;  %v3468_v25 = vld [vmem:[#allocation7 + $0x44] ss:$16 sps:$4 sm:$0xff]   ;;  %v3470_v26 = vld [vmem:[#allocation7 + $0x4c] ss:$16 sps:$4 sm:$0xff]   ;;  %v3472_v27 = vld [vmem:[#allocation7 + $0x40] ss:$16 sps:$4 sm:$0xff]  }
 0x204   :  { %v3473_v28 = vld [vmem:[#allocation7 + $0x48] ss:$16 sps:$4 sm:$0xff]   ;;  %v3474_v29 = vld [vmem:[#allocation7 + $0x24] ss:$16 sps:$4 sm:$0xff]   ;;  %v3476_v30 = vld [vmem:[#allocation7 + $0x2c] ss:$16 sps:$4 sm:$0xff]  }
 0x205   :  { %v3478_v31 = vld [vmem:[#allocation7 + $0x20] ss:$16 sps:$4 sm:$0xff]   ;;  %v3479_v32 = vld [vmem:[#allocation7 + $0x28] ss:$16 sps:$4 sm:$0xff]   ;;  %v3480_v33 = vld [vmem:[#allocation7 + $0x4] ss:$16 sps:$4 sm:$0xff]  }
 0x206   :  { %691 = vmatpush1.bf16.msra.mxu0 %v3454_v15  ;;  %732 = vmatpush1.bf16.msra.mxu1 %v3455_v16  ;;  %v3482_v34 = vld [vmem:[#allocation7 + $0xc] ss:$16 sps:$4 sm:$0xff]   ;;  %v3484_v35 = vld [vmem:[#allocation7] ss:$16 sps:$4 sm:$0xff]   ;;  %v3485_v36 = vld [vmem:[#allocation7 + $0x8] ss:$16 sps:$4 sm:$0xff]  }
 0x207   :  { %692 = vmatprep.subr.bf16.mxu0 %v3456_v17  ;;  %733 = vmatprep.subr.bf16.mxu1 %v3458_v18  ;;  %v492_v52 = vld [vmem:[#allocation2 + $0x1] ss:$8 sm:$0xf] }
 0x20a   :  { %693 = vmatpush1.bf16.msra.mxu0 %v3460_v19  ;;  %734 = vmatpush1.bf16.msra.mxu1 %v3461_v20 }
 0x20b   :  { %694 = vmatprep.subr.bf16.mxu0 %v3462_v21  ;;  %735 = vmatprep.subr.bf16.mxu1 %v3464_v22 }
 0x20e   :  { %695 = vmatpush1.bf16.msra.mxu0 %v3466_v23  ;;  %736 = vmatpush1.bf16.msra.mxu1 %v3467_v24 }
 0x20f   :  { %696 = vmatprep.subr.bf16.mxu0 %v3468_v25  ;;  %737 = vmatprep.subr.bf16.mxu1 %v3470_v26 }
 0x212   :  { %697 = vmatpush1.bf16.msra.mxu0 %v3472_v27  ;;  %738 = vmatpush1.bf16.msra.mxu1 %v3473_v28 }
 0x213   :  { %698 = vmatprep.subr.bf16.mxu0 %v3474_v29  ;;  %739 = vmatprep.subr.bf16.mxu1 %v3476_v30 }
 0x216   :  { %699 = vmatpush1.bf16.msra.mxu0 %v3478_v31  ;;  %740 = vmatpush1.bf16.msra.mxu1 %v3479_v32 }
 0x217   :  { %700 = vmatprep.subr.bf16.mxu0 %v3480_v33  ;;  %741 = vmatprep.subr.bf16.mxu1 %v3482_v34 }
 0x21a   :  { %701 = vmatpush1.bf16.msra.mxu0 %v3484_v35  ;;  %742 = vmatpush1.bf16.msra.mxu1 %v3485_v36 }
 0x21d   :  { %719 = vmatmul.mubr.bf16.vlgmr.msra.gmra.mxu0 %v493_v37  ;;  %760 = vmatmul.mubr.bf16.vlgmr.msra.gmra.mxu1 %v493_v37 }
 0x2dd   :  { %v720_v38 = vpop.f32.mrf.mxu0  ;;  %v761_v39 = vpop.f32.mrf.mxu1 }
 0x2df   :  { %v722_v41 = vpop.f32.mrf.mxu0  ;;  %v763_v42 = vpop.f32.mrf.mxu1 }
 0x2e0   :  { %v772_v43 = vcombine.low %v720_v38, %v722_v41  ;;  %v773_v44 = vcombine.low %v761_v39, %v763_v42 }
 0x2e1   :  { %v724_v45 = vpop.f32.mrf.mxu0  ;;  %v765_v46 = vpop.f32.mrf.mxu1 }
 0x2e2   :  { %v780_v47 = vrot.slane %v772_v43, %v4332_v40  ;;  %v787_v48 = vrot.slane %v773_v44, %v4332_v40 }
 0x2e3   :  { %v725_v49 = vpop.f32.mrf.mxu0  ;;  %v766_v50 = vpop.f32.mrf.mxu1 }
 0x2e4   :  { %v788_v51 = vcombine.low %v780_v47, %v787_v48 }
 0x2e6   :  { %v795_v53 = vrot.slane %v788_v51, %v4332_v40 }
 0x2e8   :  { %v797_v54 = vadd.f32 %v795_v53, %v492_v52 }
 0x2ea   :  { %v3115_v55 = vmul.f32 -1.442695, %v797_v54  ;;  %v805_v58 = vrot.slane %v797_v54, 2 }
 0x2ec   :  { %3486 = vpow2.f32 %v3115_v55 }
 0x2f9   :  { %v3487_v56 = vpop.eup %3486 }
 0x2fa   :  { %v801_v57 = vadd.f32 1.0, %v3487_v56 }
 0x2fc   :  { %3488 = vrcp.f32 %v801_v57 }
 0x2fd   :  { %3490 = vtanh.f32 %v805_v58 }
 0x309   :  { %v3489_v59 = vpop.eup %3488 }
 0x30a   :  { %v809_v60 = vrot.slane %v3489_v59, 1  ;;  %v3491_v61 = vpop.eup %3490  ;;  %v815_v3 = vrot.slane %v3489_v59, 3 }
 0x30b   :  { %v812_v63 = vmul.f32 %v3491_v61, %v3489_v59 }
 0x30c   :  { %v811_v62 = vmul.f32 %v809_v60, %v4337_v1 }
 0x30e   :  { %v4351_v2 = vadd.f32 %v812_v63, %v811_v62 }
 0x310   :  { %3492 = vtanh.f32 %v4351_v2 }
 0x31d   :  { %v3493_v4 = vpop.eup %3492 }
 0x31e   :  { %v4354_v5 = vmul.f32 %v3493_v4, %v815_v3 }
 0x320   :  { %818 = vst [vmem:[#allocation4 + $0x1] sm:$0x1] %v4354_v5 }
 0x321   :  { %4096 = dma.done.wait [#allocation3 + $0x2], 64 }
 0x322   :  { %4097 = vsyncadd [#allocation3 + $0x2], 4294967232  ;;  %1048 = vmatprep.mubr.bf16.mxu0 %v4127_v0  ;;  %1089 = vmatprep.mubr.bf16.mxu1 %v4127_v0  ;;  %v3494_v6 = vld [vmem:[#allocation7 + $0xe4] ss:$16 sps:$4 sm:$0xff]   ;;  %v3496_v7 = vld [vmem:[#allocation7 + $0xec] ss:$16 sps:$4 sm:$0xff]   ;;  %v823_v37 = vpack.c.bf16 %v4354_v5, %v4354_v5 }
 0x323   :  { %1016 = vmatprep.subr.bf16.mxu0 %v3494_v6  ;;  %v3498_v1 = vld [vmem:[#allocation7 + $0xe0] ss:$16 sps:$4 sm:$0xff]   ;;  %v3499_v8 = vld [vmem:[#allocation7 + $0xe8] ss:$16 sps:$4 sm:$0xff]   ;;  %1057 = vmatprep.subr.bf16.mxu1 %v3496_v7  ;;  %v3500_v9 = vld [vmem:[#allocation7 + $0xc4] ss:$16 sps:$4 sm:$0xff]  }
 0x324   :  { %1017 = vmatpush1.bf16.msra.mxu0 %v3498_v1  ;;  %1058 = vmatpush1.bf16.msra.mxu1 %v3499_v8  ;;  %v3502_v10 = vld [vmem:[#allocation7 + $0xcc] ss:$16 sps:$4 sm:$0xff]   ;;  %v3504_v11 = vld [vmem:[#allocation7 + $0xc0] ss:$16 sps:$4 sm:$0xff]   ;;  %v3505_v12 = vld [vmem:[#allocation7 + $0xc8] ss:$16 sps:$4 sm:$0xff]  }
 0x325   :  { %1018 = vmatprep.subr.bf16.mxu0 %v3500_v9  ;;  %1059 = vmatprep.subr.bf16.mxu1 %v3502_v10  ;;  %v3506_v13 = vld [vmem:[#allocation7 + $0xa4] ss:$16 sps:$4 sm:$0xff]   ;;  %v3508_v14 = vld [vmem:[#allocation7 + $0xac] ss:$16 sps:$4 sm:$0xff]   ;;  %v3510_v15 = vld [vmem:[#allocation7 + $0xa0] ss:$16 sps:$4 sm:$0xff]  }
 0x326   :  { %v3511_v16 = vld [vmem:[#allocation7 + $0xa8] ss:$16 sps:$4 sm:$0xff]   ;;  %v3512_v17 = vld [vmem:[#allocation7 + $0x84] ss:$16 sps:$4 sm:$0xff]   ;;  %v3514_v18 = vld [vmem:[#allocation7 + $0x8c] ss:$16 sps:$4 sm:$0xff]  }
 0x327   :  { %v3516_v19 = vld [vmem:[#allocation7 + $0x80] ss:$16 sps:$4 sm:$0xff]   ;;  %v3517_v20 = vld [vmem:[#allocation7 + $0x88] ss:$16 sps:$4 sm:$0xff]   ;;  %v3518_v21 = vld [vmem:[#allocation7 + $0x64] ss:$16 sps:$4 sm:$0xff]  }
 0x328   :  { %1019 = vmatpush1.bf16.msra.mxu0 %v3504_v11  ;;  %1060 = vmatpush1.bf16.msra.mxu1 %v3505_v12  ;;  %v3520_v22 = vld [vmem:[#allocation7 + $0x6c] ss:$16 sps:$4 sm:$0xff]   ;;  %v3522_v23 = vld [vmem:[#allocation7 + $0x60] ss:$16 sps:$4 sm:$0xff]   ;;  %v3523_v24 = vld [vmem:[#allocation7 + $0x68] ss:$16 sps:$4 sm:$0xff]  }
 0x329   :  { %1020 = vmatprep.subr.bf16.mxu0 %v3506_v13  ;;  %1061 = vmatprep.subr.bf16.mxu1 %v3508_v14  ;;  %v3524_v25 = vld [vmem:[#allocation7 + $0x44] ss:$16 sps:$4 sm:$0xff]   ;;  %v3526_v26 = vld [vmem:[#allocation7 + $0x4c] ss:$16 sps:$4 sm:$0xff]   ;;  %v3528_v27 = vld [vmem:[#allocation7 + $0x40] ss:$16 sps:$4 sm:$0xff]  }
 0x32a   :  { %v3529_v28 = vld [vmem:[#allocation7 + $0x48] ss:$16 sps:$4 sm:$0xff]   ;;  %v3530_v29 = vld [vmem:[#allocation7 + $0x24] ss:$16 sps:$4 sm:$0xff]   ;;  %v3532_v30 = vld [vmem:[#allocation7 + $0x2c] ss:$16 sps:$4 sm:$0xff]  }
 0x32b   :  { %v3534_v31 = vld [vmem:[#allocation7 + $0x20] ss:$16 sps:$4 sm:$0xff]   ;;  %v3535_v32 = vld [vmem:[#allocation7 + $0x28] ss:$16 sps:$4 sm:$0xff]   ;;  %v3536_v33 = vld [vmem:[#allocation7 + $0x4] ss:$16 sps:$4 sm:$0xff]  }
 0x32c   :  { %1021 = vmatpush1.bf16.msra.mxu0 %v3510_v15  ;;  %1062 = vmatpush1.bf16.msra.mxu1 %v3511_v16  ;;  %v3538_v34 = vld [vmem:[#allocation7 + $0xc] ss:$16 sps:$4 sm:$0xff]   ;;  %v3540_v35 = vld [vmem:[#allocation7] ss:$16 sps:$4 sm:$0xff]   ;;  %v3541_v36 = vld [vmem:[#allocation7 + $0x8] ss:$16 sps:$4 sm:$0xff]  }
 0x32d   :  { %1022 = vmatprep.subr.bf16.mxu0 %v3512_v17  ;;  %1063 = vmatprep.subr.bf16.mxu1 %v3514_v18  ;;  %v822_v52 = vld [vmem:[#allocation2 + $0x2] ss:$8 sm:$0xf] }
 0x330   :  { %1023 = vmatpush1.bf16.msra.mxu0 %v3516_v19  ;;  %1064 = vmatpush1.bf16.msra.mxu1 %v3517_v20 }
 0x331   :  { %1024 = vmatprep.subr.bf16.mxu0 %v3518_v21  ;;  %1065 = vmatprep.subr.bf16.mxu1 %v3520_v22 }
 0x334   :  { %1025 = vmatpush1.bf16.msra.mxu0 %v3522_v23  ;;  %1066 = vmatpush1.bf16.msra.mxu1 %v3523_v24 }
 0x335   :  { %1026 = vmatprep.subr.bf16.mxu0 %v3524_v25  ;;  %1067 = vmatprep.subr.bf16.mxu1 %v3526_v26 }
 0x338   :  { %1027 = vmatpush1.bf16.msra.mxu0 %v3528_v27  ;;  %1068 = vmatpush1.bf16.msra.mxu1 %v3529_v28 }
 0x339   :  { %1028 = vmatprep.subr.bf16.mxu0 %v3530_v29  ;;  %1069 = vmatprep.subr.bf16.mxu1 %v3532_v30 }
 0x33c   :  { %1029 = vmatpush1.bf16.msra.mxu0 %v3534_v31  ;;  %1070 = vmatpush1.bf16.msra.mxu1 %v3535_v32 }
 0x33d   :  { %1030 = vmatprep.subr.bf16.mxu0 %v3536_v33  ;;  %1071 = vmatprep.subr.bf16.mxu1 %v3538_v34 }
 0x340   :  { %1031 = vmatpush1.bf16.msra.mxu0 %v3540_v35  ;;  %1072 = vmatpush1.bf16.msra.mxu1 %v3541_v36 }
 0x343   :  { %1049 = vmatmul.mubr.bf16.vlgmr.msra.gmra.mxu0 %v823_v37  ;;  %1090 = vmatmul.mubr.bf16.vlgmr.msra.gmra.mxu1 %v823_v37 }
 0x403   :  { %v1050_v38 = vpop.f32.mrf.mxu0  ;;  %v1091_v39 = vpop.f32.mrf.mxu1 }
 0x405   :  { %v1052_v41 = vpop.f32.mrf.mxu0  ;;  %v1093_v42 = vpop.f32.mrf.mxu1 }
 0x406   :  { %v1102_v43 = vcombine.low %v1050_v38, %v1052_v41  ;;  %v1103_v44 = vcombine.low %v1091_v39, %v1093_v42 }
 0x407   :  { %v1054_v45 = vpop.f32.mrf.mxu0  ;;  %v1095_v46 = vpop.f32.mrf.mxu1 }
 0x408   :  { %v1110_v47 = vrot.slane %v1102_v43, %v4332_v40  ;;  %v1117_v48 = vrot.slane %v1103_v44, %v4332_v40 }
 0x409   :  { %v1055_v49 = vpop.f32.mrf.mxu0  ;;  %v1096_v50 = vpop.f32.mrf.mxu1 }
 0x40a   :  { %v1118_v51 = vcombine.low %v1110_v47, %v1117_v48 }
 0x40c   :  { %v1125_v53 = vrot.slane %v1118_v51, %v4332_v40 }
 0x40e   :  { %v1127_v54 = vadd.f32 %v1125_v53, %v822_v52 }
 0x410   :  { %v3148_v55 = vmul.f32 -1.442695, %v1127_v54  ;;  %v1135_v58 = vrot.slane %v1127_v54, 2 }
 0x412   :  { %3542 = vpow2.f32 %v3148_v55 }
 0x41f   :  { %v3543_v56 = vpop.eup %3542 }
 0x420   :  { %v1131_v57 = vadd.f32 1.0, %v3543_v56 }
 0x422   :  { %3544 = vrcp.f32 %v1131_v57 }
 0x423   :  { %3546 = vtanh.f32 %v1135_v58 }
 0x42f   :  { %v3545_v59 = vpop.eup %3544 }
 0x430   :  { %v1139_v60 = vrot.slane %v3545_v59, 1  ;;  %v3547_v61 = vpop.eup %3546  ;;  %v1145_v4 = vrot.slane %v3545_v59, 3 }
 0x431   :  { %v1142_v63 = vmul.f32 %v3547_v61, %v3545_v59 }
 0x432   :  { %v1141_v62 = vmul.f32 %v1139_v60, %v4351_v2 }
 0x434   :  { %v4365_v3 = vadd.f32 %v1142_v63, %v1141_v62 }
 0x436   :  { %3548 = vtanh.f32 %v4365_v3 }
 0x443   :  { %v3549_v5 = vpop.eup %3548 }
 0x444   :  { %v4368_v6 = vmul.f32 %v3549_v5, %v1145_v4 }
 0x446   :  { %1148 = vst [vmem:[#allocation4 + $0x2] sm:$0x1] %v4368_v6 }
 0x447   :  { %4098 = dma.done.wait [#allocation3 + $0x3], 64 }
 0x448   :  { %4099 = vsyncadd [#allocation3 + $0x3], 4294967232  ;;  %1378 = vmatprep.mubr.bf16.mxu0 %v4127_v0  ;;  %1419 = vmatprep.mubr.bf16.mxu1 %v4127_v0  ;;  %v3550_v7 = vld [vmem:[#allocation7 + $0xe4] ss:$16 sps:$4 sm:$0xff]   ;;  %v3552_v1 = vld [vmem:[#allocation7 + $0xec] ss:$16 sps:$4 sm:$0xff]   ;;  %v1153_v37 = vpack.c.bf16 %v4368_v6, %v4368_v6 }
 0x449   :  { %1346 = vmatprep.subr.bf16.mxu0 %v3550_v7  ;;  %v3554_v2 = vld [vmem:[#allocation7 + $0xe0] ss:$16 sps:$4 sm:$0xff]   ;;  %v3555_v8 = vld [vmem:[#allocation7 + $0xe8] ss:$16 sps:$4 sm:$0xff]   ;;  %1387 = vmatprep.subr.bf16.mxu1 %v3552_v1  ;;  %v3556_v9 = vld [vmem:[#allocation7 + $0xc4] ss:$16 sps:$4 sm:$0xff]  }
 0x44a   :  { %1347 = vmatpush1.bf16.msra.mxu0 %v3554_v2  ;;  %1388 = vmatpush1.bf16.msra.mxu1 %v3555_v8  ;;  %v3558_v10 = vld [vmem:[#allocation7 + $0xcc] ss:$16 sps:$4 sm:$0xff]   ;;  %v3560_v11 = vld [vmem:[#allocation7 + $0xc0] ss:$16 sps:$4 sm:$0xff]   ;;  %v3561_v12 = vld [vmem:[#allocation7 + $0xc8] ss:$16 sps:$4 sm:$0xff]  }
 0x44b   :  { %1348 = vmatprep.subr.bf16.mxu0 %v3556_v9  ;;  %1389 = vmatprep.subr.bf16.mxu1 %v3558_v10  ;;  %v3562_v13 = vld [vmem:[#allocation7 + $0xa4] ss:$16 sps:$4 sm:$0xff]   ;;  %v3564_v14 = vld [vmem:[#allocation7 + $0xac] ss:$16 sps:$4 sm:$0xff]   ;;  %v3566_v15 = vld [vmem:[#allocation7 + $0xa0] ss:$16 sps:$4 sm:$0xff]  }
 0x44c   :  { %v3567_v16 = vld [vmem:[#allocation7 + $0xa8] ss:$16 sps:$4 sm:$0xff]   ;;  %v3568_v17 = vld [vmem:[#allocation7 + $0x84] ss:$16 sps:$4 sm:$0xff]   ;;  %v3570_v18 = vld [vmem:[#allocation7 + $0x8c] ss:$16 sps:$4 sm:$0xff]  }
 0x44d   :  { %v3572_v19 = vld [vmem:[#allocation7 + $0x80] ss:$16 sps:$4 sm:$0xff]   ;;  %v3573_v20 = vld [vmem:[#allocation7 + $0x88] ss:$16 sps:$4 sm:$0xff]   ;;  %v3574_v21 = vld [vmem:[#allocation7 + $0x64] ss:$16 sps:$4 sm:$0xff]  }
 0x44e   :  { %1349 = vmatpush1.bf16.msra.mxu0 %v3560_v11  ;;  %1390 = vmatpush1.bf16.msra.mxu1 %v3561_v12  ;;  %v3576_v22 = vld [vmem:[#allocation7 + $0x6c] ss:$16 sps:$4 sm:$0xff]   ;;  %v3578_v23 = vld [vmem:[#allocation7 + $0x60] ss:$16 sps:$4 sm:$0xff]   ;;  %v3579_v24 = vld [vmem:[#allocation7 + $0x68] ss:$16 sps:$4 sm:$0xff]  }
 0x44f   :  { %1350 = vmatprep.subr.bf16.mxu0 %v3562_v13  ;;  %1391 = vmatprep.subr.bf16.mxu1 %v3564_v14  ;;  %v3580_v25 = vld [vmem:[#allocation7 + $0x44] ss:$16 sps:$4 sm:$0xff]   ;;  %v3582_v26 = vld [vmem:[#allocation7 + $0x4c] ss:$16 sps:$4 sm:$0xff]   ;;  %v3584_v27 = vld [vmem:[#allocation7 + $0x40] ss:$16 sps:$4 sm:$0xff]  }
 0x450   :  { %v3585_v28 = vld [vmem:[#allocation7 + $0x48] ss:$16 sps:$4 sm:$0xff]   ;;  %v3586_v29 = vld [vmem:[#allocation7 + $0x24] ss:$16 sps:$4 sm:$0xff]   ;;  %v3588_v30 = vld [vmem:[#allocation7 + $0x2c] ss:$16 sps:$4 sm:$0xff]  }
 0x451   :  { %v3590_v31 = vld [vmem:[#allocation7 + $0x20] ss:$16 sps:$4 sm:$0xff]   ;;  %v3591_v32 = vld [vmem:[#allocation7 + $0x28] ss:$16 sps:$4 sm:$0xff]   ;;  %v3592_v33 = vld [vmem:[#allocation7 + $0x4] ss:$16 sps:$4 sm:$0xff]  }
 0x452   :  { %1351 = vmatpush1.bf16.msra.mxu0 %v3566_v15  ;;  %1392 = vmatpush1.bf16.msra.mxu1 %v3567_v16  ;;  %v3594_v34 = vld [vmem:[#allocation7 + $0xc] ss:$16 sps:$4 sm:$0xff]   ;;  %v3596_v35 = vld [vmem:[#allocation7] ss:$16 sps:$4 sm:$0xff]   ;;  %v3597_v36 = vld [vmem:[#allocation7 + $0x8] ss:$16 sps:$4 sm:$0xff]  }
 0x453   :  { %1352 = vmatprep.subr.bf16.mxu0 %v3568_v17  ;;  %1393 = vmatprep.subr.bf16.mxu1 %v3570_v18  ;;  %v1152_v52 = vld [vmem:[#allocation2 + $0x3] ss:$8 sm:$0xf] }
 0x456   :  { %1353 = vmatpush1.bf16.msra.mxu0 %v3572_v19  ;;  %1394 = vmatpush1.bf16.msra.mxu1 %v3573_v20 }
 0x457   :  { %1354 = vmatprep.subr.bf16.mxu0 %v3574_v21  ;;  %1395 = vmatprep.subr.bf16.mxu1 %v3576_v22 }
 0x45a   :  { %1355 = vmatpush1.bf16.msra.mxu0 %v3578_v23  ;;  %1396 = vmatpush1.bf16.msra.mxu1 %v3579_v24 }
 0x45b   :  { %1356 = vmatprep.subr.bf16.mxu0 %v3580_v25  ;;  %1397 = vmatprep.subr.bf16.mxu1 %v3582_v26 }
 0x45e   :  { %1357 = vmatpush1.bf16.msra.mxu0 %v3584_v27  ;;  %1398 = vmatpush1.bf16.msra.mxu1 %v3585_v28 }
 0x45f   :  { %1358 = vmatprep.subr.bf16.mxu0 %v3586_v29  ;;  %1399 = vmatprep.subr.bf16.mxu1 %v3588_v30 }
 0x462   :  { %1359 = vmatpush1.bf16.msra.mxu0 %v3590_v31  ;;  %1400 = vmatpush1.bf16.msra.mxu1 %v3591_v32 }
 0x463   :  { %1360 = vmatprep.subr.bf16.mxu0 %v3592_v33  ;;  %1401 = vmatprep.subr.bf16.mxu1 %v3594_v34 }
 0x466   :  { %1361 = vmatpush1.bf16.msra.mxu0 %v3596_v35  ;;  %1402 = vmatpush1.bf16.msra.mxu1 %v3597_v36 }
 0x469   :  { %1379 = vmatmul.mubr.bf16.vlgmr.msra.gmra.mxu0 %v1153_v37  ;;  %1420 = vmatmul.mubr.bf16.vlgmr.msra.gmra.mxu1 %v1153_v37 }
 0x529   :  { %v1380_v38 = vpop.f32.mrf.mxu0  ;;  %v1421_v39 = vpop.f32.mrf.mxu1 }
 0x52b   :  { %v1382_v41 = vpop.f32.mrf.mxu0  ;;  %v1423_v42 = vpop.f32.mrf.mxu1 }
 0x52c   :  { %v1432_v43 = vcombine.low %v1380_v38, %v1382_v41  ;;  %v1433_v44 = vcombine.low %v1421_v39, %v1423_v42 }
 0x52d   :  { %v1384_v45 = vpop.f32.mrf.mxu0  ;;  %v1425_v46 = vpop.f32.mrf.mxu1 }
 0x52e   :  { %v1440_v47 = vrot.slane %v1432_v43, %v4332_v40  ;;  %v1447_v48 = vrot.slane %v1433_v44, %v4332_v40 }
 0x52f   :  { %v1385_v49 = vpop.f32.mrf.mxu0  ;;  %v1426_v50 = vpop.f32.mrf.mxu1 }
 0x530   :  { %v1448_v51 = vcombine.low %v1440_v47, %v1447_v48 }
 0x532   :  { %v1455_v53 = vrot.slane %v1448_v51, %v4332_v40 }
 0x534   :  { %v1457_v54 = vadd.f32 %v1455_v53, %v1152_v52 }
 0x536   :  { %v3181_v55 = vmul.f32 -1.442695, %v1457_v54  ;;  %v1465_v58 = vrot.slane %v1457_v54, 2 }
 0x538   :  { %3598 = vpow2.f32 %v3181_v55 }
 0x545   :  { %v3599_v56 = vpop.eup %3598 }
 0x546   :  { %v1461_v57 = vadd.f32 1.0, %v3599_v56 }
 0x548   :  { %3600 = vrcp.f32 %v1461_v57 }
 0x549   :  { %3602 = vtanh.f32 %v1465_v58 }
 0x555   :  { %v3601_v59 = vpop.eup %3600 }
 0x556   :  { %v1469_v60 = vrot.slane %v3601_v59, 1  ;;  %v3603_v61 = vpop.eup %3602  ;;  %v1475_v5 = vrot.slane %v3601_v59, 3 }
 0x557   :  { %v1472_v63 = vmul.f32 %v3603_v61, %v3601_v59 }
 0x558   :  { %v1471_v62 = vmul.f32 %v1469_v60, %v4365_v3 }
 0x55a   :  { %v4379_v4 = vadd.f32 %v1472_v63, %v1471_v62 }
 0x55c   :  { %3604 = vtanh.f32 %v4379_v4 }
 0x569   :  { %v3605_v6 = vpop.eup %3604 }
 0x56a   :  { %v4382_v7 = vmul.f32 %v3605_v6, %v1475_v5 }
 0x56c   :  { %1478 = vst [vmem:[#allocation4 + $0x3] sm:$0x1] %v4382_v7 }
 0x56d   :  { %4100 = dma.done.wait [#allocation3 + $0x4], 64 }
 0x56e   :  { %4101 = vsyncadd [#allocation3 + $0x4], 4294967232  ;;  %1708 = vmatprep.mubr.bf16.mxu0 %v4127_v0  ;;  %1749 = vmatprep.mubr.bf16.mxu1 %v4127_v0  ;;  %v3606_v1 = vld [vmem:[#allocation7 + $0xe4] ss:$16 sps:$4 sm:$0xff]   ;;  %v3608_v2 = vld [vmem:[#allocation7 + $0xec] ss:$16 sps:$4 sm:$0xff]   ;;  %v1483_v37 = vpack.c.bf16 %v4382_v7, %v4382_v7 }
 0x56f   :  { %1676 = vmatprep.subr.bf16.mxu0 %v3606_v1  ;;  %v3610_v3 = vld [vmem:[#allocation7 + $0xe0] ss:$16 sps:$4 sm:$0xff]   ;;  %v3611_v8 = vld [vmem:[#allocation7 + $0xe8] ss:$16 sps:$4 sm:$0xff]   ;;  %1717 = vmatprep.subr.bf16.mxu1 %v3608_v2  ;;  %v3612_v9 = vld [vmem:[#allocation7 + $0xc4] ss:$16 sps:$4 sm:$0xff]  }
 0x570   :  { %1677 = vmatpush1.bf16.msra.mxu0 %v3610_v3  ;;  %1718 = vmatpush1.bf16.msra.mxu1 %v3611_v8  ;;  %v3614_v10 = vld [vmem:[#allocation7 + $0xcc] ss:$16 sps:$4 sm:$0xff]   ;;  %v3616_v11 = vld [vmem:[#allocation7 + $0xc0] ss:$16 sps:$4 sm:$0xff]   ;;  %v3617_v12 = vld [vmem:[#allocation7 + $0xc8] ss:$16 sps:$4 sm:$0xff]  }
 0x571   :  { %1678 = vmatprep.subr.bf16.mxu0 %v3612_v9  ;;  %1719 = vmatprep.subr.bf16.mxu1 %v3614_v10  ;;  %v3618_v13 = vld [vmem:[#allocation7 + $0xa4] ss:$16 sps:$4 sm:$0xff]   ;;  %v3620_v14 = vld [vmem:[#allocation7 + $0xac] ss:$16 sps:$4 sm:$0xff]   ;;  %v3622_v15 = vld [vmem:[#allocation7 + $0xa0] ss:$16 sps:$4 sm:$0xff]  }
 0x572   :  { %v3623_v16 = vld [vmem:[#allocation7 + $0xa8] ss:$16 sps:$4 sm:$0xff]   ;;  %v3624_v17 = vld [vmem:[#allocation7 + $0x84] ss:$16 sps:$4 sm:$0xff]   ;;  %v3626_v18 = vld [vmem:[#allocation7 + $0x8c] ss:$16 sps:$4 sm:$0xff]  }
 0x573   :  { %v3628_v19 = vld [vmem:[#allocation7 + $0x80] ss:$16 sps:$4 sm:$0xff]   ;;  %v3629_v20 = vld [vmem:[#allocation7 + $0x88] ss:$16 sps:$4 sm:$0xff]   ;;  %v3630_v21 = vld [vmem:[#allocation7 + $0x64] ss:$16 sps:$4 sm:$0xff]  }
 0x574   :  { %1679 = vmatpush1.bf16.msra.mxu0 %v3616_v11  ;;  %1720 = vmatpush1.bf16.msra.mxu1 %v3617_v12  ;;  %v3632_v22 = vld [vmem:[#allocation7 + $0x6c] ss:$16 sps:$4 sm:$0xff]   ;;  %v3634_v23 = vld [vmem:[#allocation7 + $0x60] ss:$16 sps:$4 sm:$0xff]   ;;  %v3635_v24 = vld [vmem:[#allocation7 + $0x68] ss:$16 sps:$4 sm:$0xff]  }
 0x575   :  { %1680 = vmatprep.subr.bf16.mxu0 %v3618_v13  ;;  %1721 = vmatprep.subr.bf16.mxu1 %v3620_v14  ;;  %v3636_v25 = vld [vmem:[#allocation7 + $0x44] ss:$16 sps:$4 sm:$0xff]   ;;  %v3638_v26 = vld [vmem:[#allocation7 + $0x4c] ss:$16 sps:$4 sm:$0xff]   ;;  %v3640_v27 = vld [vmem:[#allocation7 + $0x40] ss:$16 sps:$4 sm:$0xff]  }
 0x576   :  { %v3641_v28 = vld [vmem:[#allocation7 + $0x48] ss:$16 sps:$4 sm:$0xff]   ;;  %v3642_v29 = vld [vmem:[#allocation7 + $0x24] ss:$16 sps:$4 sm:$0xff]   ;;  %v3644_v30 = vld [vmem:[#allocation7 + $0x2c] ss:$16 sps:$4 sm:$0xff]  }
 0x577   :  { %v3646_v31 = vld [vmem:[#allocation7 + $0x20] ss:$16 sps:$4 sm:$0xff]   ;;  %v3647_v32 = vld [vmem:[#allocation7 + $0x28] ss:$16 sps:$4 sm:$0xff]   ;;  %v3648_v33 = vld [vmem:[#allocation7 + $0x4] ss:$16 sps:$4 sm:$0xff]  }
 0x578   :  { %1681 = vmatpush1.bf16.msra.mxu0 %v3622_v15  ;;  %1722 = vmatpush1.bf16.msra.mxu1 %v3623_v16  ;;  %v3650_v34 = vld [vmem:[#allocation7 + $0xc] ss:$16 sps:$4 sm:$0xff]   ;;  %v3652_v35 = vld [vmem:[#allocation7] ss:$16 sps:$4 sm:$0xff]   ;;  %v3653_v36 = vld [vmem:[#allocation7 + $0x8] ss:$16 sps:$4 sm:$0xff]  }
 0x579   :  { %1682 = vmatprep.subr.bf16.mxu0 %v3624_v17  ;;  %1723 = vmatprep.subr.bf16.mxu1 %v3626_v18  ;;  %v1482_v52 = vld [vmem:[#allocation2 + $0x4] ss:$8 sm:$0xf] }
 0x57c   :  { %1683 = vmatpush1.bf16.msra.mxu0 %v3628_v19  ;;  %1724 = vmatpush1.bf16.msra.mxu1 %v3629_v20 }
 0x57d   :  { %1684 = vmatprep.subr.bf16.mxu0 %v3630_v21  ;;  %1725 = vmatprep.subr.bf16.mxu1 %v3632_v22 }
 0x580   :  { %1685 = vmatpush1.bf16.msra.mxu0 %v3634_v23  ;;  %1726 = vmatpush1.bf16.msra.mxu1 %v3635_v24 }
 0x581   :  { %1686 = vmatprep.subr.bf16.mxu0 %v3636_v25  ;;  %1727 = vmatprep.subr.bf16.mxu1 %v3638_v26 }
 0x584   :  { %1687 = vmatpush1.bf16.msra.mxu0 %v3640_v27  ;;  %1728 = vmatpush1.bf16.msra.mxu1 %v3641_v28 }
 0x585   :  { %1688 = vmatprep.subr.bf16.mxu0 %v3642_v29  ;;  %1729 = vmatprep.subr.bf16.mxu1 %v3644_v30 }
 0x588   :  { %1689 = vmatpush1.bf16.msra.mxu0 %v3646_v31  ;;  %1730 = vmatpush1.bf16.msra.mxu1 %v3647_v32 }
 0x589   :  { %1690 = vmatprep.subr.bf16.mxu0 %v3648_v33  ;;  %1731 = vmatprep.subr.bf16.mxu1 %v3650_v34 }
 0x58c   :  { %1691 = vmatpush1.bf16.msra.mxu0 %v3652_v35  ;;  %1732 = vmatpush1.bf16.msra.mxu1 %v3653_v36 }
 0x58f   :  { %1709 = vmatmul.mubr.bf16.vlgmr.msra.gmra.mxu0 %v1483_v37  ;;  %1750 = vmatmul.mubr.bf16.vlgmr.msra.gmra.mxu1 %v1483_v37 }
 0x64f   :  { %v1710_v38 = vpop.f32.mrf.mxu0  ;;  %v1751_v39 = vpop.f32.mrf.mxu1 }
 0x651   :  { %v1712_v41 = vpop.f32.mrf.mxu0  ;;  %v1753_v42 = vpop.f32.mrf.mxu1 }
 0x652   :  { %v1762_v43 = vcombine.low %v1710_v38, %v1712_v41  ;;  %v1763_v44 = vcombine.low %v1751_v39, %v1753_v42 }
 0x653   :  { %v1714_v45 = vpop.f32.mrf.mxu0  ;;  %v1755_v46 = vpop.f32.mrf.mxu1 }
 0x654   :  { %v1770_v47 = vrot.slane %v1762_v43, %v4332_v40  ;;  %v1777_v48 = vrot.slane %v1763_v44, %v4332_v40 }
 0x655   :  { %v1715_v49 = vpop.f32.mrf.mxu0  ;;  %v1756_v50 = vpop.f32.mrf.mxu1 }
 0x656   :  { %v1778_v51 = vcombine.low %v1770_v47, %v1777_v48 }
 0x658   :  { %v1785_v53 = vrot.slane %v1778_v51, %v4332_v40 }
 0x65a   :  { %v1787_v54 = vadd.f32 %v1785_v53, %v1482_v52 }
 0x65c   :  { %v3214_v55 = vmul.f32 -1.442695, %v1787_v54  ;;  %v1795_v58 = vrot.slane %v1787_v54, 2 }
 0x65e   :  { %3654 = vpow2.f32 %v3214_v55 }
 0x66b   :  { %v3655_v56 = vpop.eup %3654 }
 0x66c   :  { %v1791_v57 = vadd.f32 1.0, %v3655_v56 }
 0x66e   :  { %3656 = vrcp.f32 %v1791_v57 }
 0x66f   :  { %3658 = vtanh.f32 %v1795_v58 }
 0x67b   :  { %v3657_v59 = vpop.eup %3656 }
 0x67c   :  { %v1799_v60 = vrot.slane %v3657_v59, 1  ;;  %v3659_v61 = vpop.eup %3658  ;;  %v1805_v6 = vrot.slane %v3657_v59, 3 }
 0x67d   :  { %v1802_v63 = vmul.f32 %v3659_v61, %v3657_v59 }
 0x67e   :  { %v1801_v62 = vmul.f32 %v1799_v60, %v4379_v4 }
 0x680   :  { %v4393_v5 = vadd.f32 %v1802_v63, %v1801_v62 }
 0x682   :  { %3660 = vtanh.f32 %v4393_v5 }
 0x68f   :  { %v3661_v7 = vpop.eup %3660 }
 0x690   :  { %v4396_v1 = vmul.f32 %v3661_v7, %v1805_v6 }
 0x692   :  { %1808 = vst [vmem:[#allocation4 + $0x4] sm:$0x1] %v4396_v1 }
 0x693   :  { %4102 = dma.done.wait [#allocation3 + $0x5], 64 }
 0x694   :  { %4103 = vsyncadd [#allocation3 + $0x5], 4294967232  ;;  %2038 = vmatprep.mubr.bf16.mxu0 %v4127_v0  ;;  %2079 = vmatprep.mubr.bf16.mxu1 %v4127_v0  ;;  %v3662_v2 = vld [vmem:[#allocation7 + $0xe4] ss:$16 sps:$4 sm:$0xff]   ;;  %v3664_v3 = vld [vmem:[#allocation7 + $0xec] ss:$16 sps:$4 sm:$0xff]   ;;  %v1813_v37 = vpack.c.bf16 %v4396_v1, %v4396_v1 }
 0x695   :  { %2006 = vmatprep.subr.bf16.mxu0 %v3662_v2  ;;  %v3666_v4 = vld [vmem:[#allocation7 + $0xe0] ss:$16 sps:$4 sm:$0xff]   ;;  %v3667_v8 = vld [vmem:[#allocation7 + $0xe8] ss:$16 sps:$4 sm:$0xff]   ;;  %2047 = vmatprep.subr.bf16.mxu1 %v3664_v3  ;;  %v3668_v9 = vld [vmem:[#allocation7 + $0xc4] ss:$16 sps:$4 sm:$0xff]  }
 0x696   :  { %2007 = vmatpush1.bf16.msra.mxu0 %v3666_v4  ;;  %2048 = vmatpush1.bf16.msra.mxu1 %v3667_v8  ;;  %v3670_v10 = vld [vmem:[#allocation7 + $0xcc] ss:$16 sps:$4 sm:$0xff]   ;;  %v3672_v11 = vld [vmem:[#allocation7 + $0xc0] ss:$16 sps:$4 sm:$0xff]   ;;  %v3673_v12 = vld [vmem:[#allocation7 + $0xc8] ss:$16 sps:$4 sm:$0xff]  }
 0x697   :  { %2008 = vmatprep.subr.bf16.mxu0 %v3668_v9  ;;  %2049 = vmatprep.subr.bf16.mxu1 %v3670_v10  ;;  %v3674_v13 = vld [vmem:[#allocation7 + $0xa4] ss:$16 sps:$4 sm:$0xff]   ;;  %v3676_v14 = vld [vmem:[#allocation7 + $0xac] ss:$16 sps:$4 sm:$0xff]   ;;  %v3678_v15 = vld [vmem:[#allocation7 + $0xa0] ss:$16 sps:$4 sm:$0xff]  }
 0x698   :  { %v3679_v16 = vld [vmem:[#allocation7 + $0xa8] ss:$16 sps:$4 sm:$0xff]   ;;  %v3680_v17 = vld [vmem:[#allocation7 + $0x84] ss:$16 sps:$4 sm:$0xff]   ;;  %v3682_v18 = vld [vmem:[#allocation7 + $0x8c] ss:$16 sps:$4 sm:$0xff]  }
 0x699   :  { %v3684_v19 = vld [vmem:[#allocation7 + $0x80] ss:$16 sps:$4 sm:$0xff]   ;;  %v3685_v20 = vld [vmem:[#allocation7 + $0x88] ss:$16 sps:$4 sm:$0xff]   ;;  %v3686_v21 = vld [vmem:[#allocation7 + $0x64] ss:$16 sps:$4 sm:$0xff]  }
 0x69a   :  { %2009 = vmatpush1.bf16.msra.mxu0 %v3672_v11  ;;  %2050 = vmatpush1.bf16.msra.mxu1 %v3673_v12  ;;  %v3688_v22 = vld [vmem:[#allocation7 + $0x6c] ss:$16 sps:$4 sm:$0xff]   ;;  %v3690_v23 = vld [vmem:[#allocation7 + $0x60] ss:$16 sps:$4 sm:$0xff]   ;;  %v3691_v24 = vld [vmem:[#allocation7 + $0x68] ss:$16 sps:$4 sm:$0xff]  }
 0x69b   :  { %2010 = vmatprep.subr.bf16.mxu0 %v3674_v13  ;;  %2051 = vmatprep.subr.bf16.mxu1 %v3676_v14  ;;  %v3692_v25 = vld [vmem:[#allocation7 + $0x44] ss:$16 sps:$4 sm:$0xff]   ;;  %v3694_v26 = vld [vmem:[#allocation7 + $0x4c] ss:$16 sps:$4 sm:$0xff]   ;;  %v3696_v27 = vld [vmem:[#allocation7 + $0x40] ss:$16 sps:$4 sm:$0xff]  }
 0x69c   :  { %v3697_v28 = vld [vmem:[#allocation7 + $0x48] ss:$16 sps:$4 sm:$0xff]   ;;  %v3698_v29 = vld [vmem:[#allocation7 + $0x24] ss:$16 sps:$4 sm:$0xff]   ;;  %v3700_v30 = vld [vmem:[#allocation7 + $0x2c] ss:$16 sps:$4 sm:$0xff]  }
 0x69d   :  { %v3702_v31 = vld [vmem:[#allocation7 + $0x20] ss:$16 sps:$4 sm:$0xff]   ;;  %v3703_v32 = vld [vmem:[#allocation7 + $0x28] ss:$16 sps:$4 sm:$0xff]   ;;  %v3704_v33 = vld [vmem:[#allocation7 + $0x4] ss:$16 sps:$4 sm:$0xff]  }
 0x69e   :  { %2011 = vmatpush1.bf16.msra.mxu0 %v3678_v15  ;;  %2052 = vmatpush1.bf16.msra.mxu1 %v3679_v16  ;;  %v3706_v34 = vld [vmem:[#allocation7 + $0xc] ss:$16 sps:$4 sm:$0xff]   ;;  %v3708_v35 = vld [vmem:[#allocation7] ss:$16 sps:$4 sm:$0xff]   ;;  %v3709_v36 = vld [vmem:[#allocation7 + $0x8] ss:$16 sps:$4 sm:$0xff]  }
 0x69f   :  { %2012 = vmatprep.subr.bf16.mxu0 %v3680_v17  ;;  %2053 = vmatprep.subr.bf16.mxu1 %v3682_v18  ;;  %v1812_v52 = vld [vmem:[#allocation2 + $0x5] ss:$8 sm:$0xf] }
 0x6a2   :  { %2013 = vmatpush1.bf16.msra.mxu0 %v3684_v19  ;;  %2054 = vmatpush1.bf16.msra.mxu1 %v3685_v20 }
 0x6a3   :  { %2014 = vmatprep.subr.bf16.mxu0 %v3686_v21  ;;  %2055 = vmatprep.subr.bf16.mxu1 %v3688_v22 }
 0x6a6   :  { %2015 = vmatpush1.bf16.msra.mxu0 %v3690_v23  ;;  %2056 = vmatpush1.bf16.msra.mxu1 %v3691_v24 }
 0x6a7   :  { %2016 = vmatprep.subr.bf16.mxu0 %v3692_v25  ;;  %2057 = vmatprep.subr.bf16.mxu1 %v3694_v26 }
 0x6aa   :  { %2017 = vmatpush1.bf16.msra.mxu0 %v3696_v27  ;;  %2058 = vmatpush1.bf16.msra.mxu1 %v3697_v28 }
 0x6ab   :  { %2018 = vmatprep.subr.bf16.mxu0 %v3698_v29  ;;  %2059 = vmatprep.subr.bf16.mxu1 %v3700_v30 }
 0x6ae   :  { %2019 = vmatpush1.bf16.msra.mxu0 %v3702_v31  ;;  %2060 = vmatpush1.bf16.msra.mxu1 %v3703_v32 }
 0x6af   :  { %2020 = vmatprep.subr.bf16.mxu0 %v3704_v33  ;;  %2061 = vmatprep.subr.bf16.mxu1 %v3706_v34 }
 0x6b2   :  { %2021 = vmatpush1.bf16.msra.mxu0 %v3708_v35  ;;  %2062 = vmatpush1.bf16.msra.mxu1 %v3709_v36 }
 0x6b5   :  { %2039 = vmatmul.mubr.bf16.vlgmr.msra.gmra.mxu0 %v1813_v37  ;;  %2080 = vmatmul.mubr.bf16.vlgmr.msra.gmra.mxu1 %v1813_v37 }
 0x775   :  { %v2040_v38 = vpop.f32.mrf.mxu0  ;;  %v2081_v39 = vpop.f32.mrf.mxu1 }
 0x777   :  { %v2042_v41 = vpop.f32.mrf.mxu0  ;;  %v2083_v42 = vpop.f32.mrf.mxu1 }
 0x778   :  { %v2092_v43 = vcombine.low %v2040_v38, %v2042_v41  ;;  %v2093_v44 = vcombine.low %v2081_v39, %v2083_v42 }
 0x779   :  { %v2044_v45 = vpop.f32.mrf.mxu0  ;;  %v2085_v46 = vpop.f32.mrf.mxu1 }
 0x77a   :  { %v2100_v47 = vrot.slane %v2092_v43, %v4332_v40  ;;  %v2107_v48 = vrot.slane %v2093_v44, %v4332_v40 }
 0x77b   :  { %v2045_v49 = vpop.f32.mrf.mxu0  ;;  %v2086_v50 = vpop.f32.mrf.mxu1 }
 0x77c   :  { %v2108_v51 = vcombine.low %v2100_v47, %v2107_v48 }
 0x77e   :  { %v2115_v53 = vrot.slane %v2108_v51, %v4332_v40 }
 0x780   :  { %v2117_v54 = vadd.f32 %v2115_v53, %v1812_v52 }
 0x782   :  { %v3247_v55 = vmul.f32 -1.442695, %v2117_v54  ;;  %v2125_v58 = vrot.slane %v2117_v54, 2 }
 0x784   :  { %3710 = vpow2.f32 %v3247_v55 }
 0x791   :  { %v3711_v56 = vpop.eup %3710 }
 0x792   :  { %v2121_v57 = vadd.f32 1.0, %v3711_v56 }
 0x794   :  { %3712 = vrcp.f32 %v2121_v57 }
 0x795   :  { %3714 = vtanh.f32 %v2125_v58 }
 0x7a1   :  { %v3713_v59 = vpop.eup %3712 }
 0x7a2   :  { %v2129_v60 = vrot.slane %v3713_v59, 1  ;;  %v3715_v61 = vpop.eup %3714  ;;  %v2135_v7 = vrot.slane %v3713_v59, 3 }
 0x7a3   :  { %v2132_v63 = vmul.f32 %v3715_v61, %v3713_v59 }
 0x7a4   :  { %v2131_v62 = vmul.f32 %v2129_v60, %v4393_v5 }
 0x7a6   :  { %v4407_v6 = vadd.f32 %v2132_v63, %v2131_v62 }
 0x7a8   :  { %3716 = vtanh.f32 %v4407_v6 }
 0x7b5   :  { %v3717_v1 = vpop.eup %3716 }
 0x7b6   :  { %v4410_v2 = vmul.f32 %v3717_v1, %v2135_v7 }
 0x7b8   :  { %2138 = vst [vmem:[#allocation4 + $0x5] sm:$0x1] %v4410_v2 }
 0x7b9   :  { %4104 = dma.done.wait [#allocation3 + $0x6], 64 }
 0x7ba   :  { %4105 = vsyncadd [#allocation3 + $0x6], 4294967232  ;;  %2368 = vmatprep.mubr.bf16.mxu0 %v4127_v0  ;;  %2409 = vmatprep.mubr.bf16.mxu1 %v4127_v0  ;;  %v3718_v3 = vld [vmem:[#allocation7 + $0xe4] ss:$16 sps:$4 sm:$0xff]   ;;  %v3720_v4 = vld [vmem:[#allocation7 + $0xec] ss:$16 sps:$4 sm:$0xff]   ;;  %v2143_v37 = vpack.c.bf16 %v4410_v2, %v4410_v2 }
 0x7bb   :  { %2336 = vmatprep.subr.bf16.mxu0 %v3718_v3  ;;  %v3722_v5 = vld [vmem:[#allocation7 + $0xe0] ss:$16 sps:$4 sm:$0xff]   ;;  %v3723_v8 = vld [vmem:[#allocation7 + $0xe8] ss:$16 sps:$4 sm:$0xff]   ;;  %2377 = vmatprep.subr.bf16.mxu1 %v3720_v4  ;;  %v3724_v9 = vld [vmem:[#allocation7 + $0xc4] ss:$16 sps:$4 sm:$0xff]  }
 0x7bc   :  { %2337 = vmatpush1.bf16.msra.mxu0 %v3722_v5  ;;  %2378 = vmatpush1.bf16.msra.mxu1 %v3723_v8  ;;  %v3726_v10 = vld [vmem:[#allocation7 + $0xcc] ss:$16 sps:$4 sm:$0xff]   ;;  %v3728_v11 = vld [vmem:[#allocation7 + $0xc0] ss:$16 sps:$4 sm:$0xff]   ;;  %v3729_v12 = vld [vmem:[#allocation7 + $0xc8] ss:$16 sps:$4 sm:$0xff]  }
 0x7bd   :  { %2338 = vmatprep.subr.bf16.mxu0 %v3724_v9  ;;  %2379 = vmatprep.subr.bf16.mxu1 %v3726_v10  ;;  %v3730_v13 = vld [vmem:[#allocation7 + $0xa4] ss:$16 sps:$4 sm:$0xff]   ;;  %v3732_v14 = vld [vmem:[#allocation7 + $0xac] ss:$16 sps:$4 sm:$0xff]   ;;  %v3734_v15 = vld [vmem:[#allocation7 + $0xa0] ss:$16 sps:$4 sm:$0xff]  }
 0x7be   :  { %v3735_v16 = vld [vmem:[#allocation7 + $0xa8] ss:$16 sps:$4 sm:$0xff]   ;;  %v3736_v17 = vld [vmem:[#allocation7 + $0x84] ss:$16 sps:$4 sm:$0xff]   ;;  %v3738_v18 = vld [vmem:[#allocation7 + $0x8c] ss:$16 sps:$4 sm:$0xff]  }
 0x7bf   :  { %v3740_v19 = vld [vmem:[#allocation7 + $0x80] ss:$16 sps:$4 sm:$0xff]   ;;  %v3741_v20 = vld [vmem:[#allocation7 + $0x88] ss:$16 sps:$4 sm:$0xff]   ;;  %v3742_v21 = vld [vmem:[#allocation7 + $0x64] ss:$16 sps:$4 sm:$0xff]  }
 0x7c0   :  { %2339 = vmatpush1.bf16.msra.mxu0 %v3728_v11  ;;  %2380 = vmatpush1.bf16.msra.mxu1 %v3729_v12  ;;  %v3744_v22 = vld [vmem:[#allocation7 + $0x6c] ss:$16 sps:$4 sm:$0xff]   ;;  %v3746_v23 = vld [vmem:[#allocation7 + $0x60] ss:$16 sps:$4 sm:$0xff]   ;;  %v3747_v24 = vld [vmem:[#allocation7 + $0x68] ss:$16 sps:$4 sm:$0xff]  }
 0x7c1   :  { %2340 = vmatprep.subr.bf16.mxu0 %v3730_v13  ;;  %2381 = vmatprep.subr.bf16.mxu1 %v3732_v14  ;;  %v3748_v25 = vld [vmem:[#allocation7 + $0x44] ss:$16 sps:$4 sm:$0xff]   ;;  %v3750_v26 = vld [vmem:[#allocation7 + $0x4c] ss:$16 sps:$4 sm:$0xff]   ;;  %v3752_v27 = vld [vmem:[#allocation7 + $0x40] ss:$16 sps:$4 sm:$0xff]  }
 0x7c2   :  { %v3753_v28 = vld [vmem:[#allocation7 + $0x48] ss:$16 sps:$4 sm:$0xff]   ;;  %v3754_v29 = vld [vmem:[#allocation7 + $0x24] ss:$16 sps:$4 sm:$0xff]   ;;  %v3756_v30 = vld [vmem:[#allocation7 + $0x2c] ss:$16 sps:$4 sm:$0xff]  }
 0x7c3   :  { %v3758_v31 = vld [vmem:[#allocation7 + $0x20] ss:$16 sps:$4 sm:$0xff]   ;;  %v3759_v32 = vld [vmem:[#allocation7 + $0x28] ss:$16 sps:$4 sm:$0xff]   ;;  %v3760_v33 = vld [vmem:[#allocation7 + $0x4] ss:$16 sps:$4 sm:$0xff]  }
 0x7c4   :  { %2341 = vmatpush1.bf16.msra.mxu0 %v3734_v15  ;;  %2382 = vmatpush1.bf16.msra.mxu1 %v3735_v16  ;;  %v3762_v34 = vld [vmem:[#allocation7 + $0xc] ss:$16 sps:$4 sm:$0xff]   ;;  %v3764_v35 = vld [vmem:[#allocation7] ss:$16 sps:$4 sm:$0xff]   ;;  %v3765_v36 = vld [vmem:[#allocation7 + $0x8] ss:$16 sps:$4 sm:$0xff]  }
 0x7c5   :  { %2342 = vmatprep.subr.bf16.mxu0 %v3736_v17  ;;  %2383 = vmatprep.subr.bf16.mxu1 %v3738_v18  ;;  %v2142_v52 = vld [vmem:[#allocation2 + $0x6] ss:$8 sm:$0xf] }
 0x7c8   :  { %2343 = vmatpush1.bf16.msra.mxu0 %v3740_v19  ;;  %2384 = vmatpush1.bf16.msra.mxu1 %v3741_v20 }
 0x7c9   :  { %2344 = vmatprep.subr.bf16.mxu0 %v3742_v21  ;;  %2385 = vmatprep.subr.bf16.mxu1 %v3744_v22 }
 0x7cc   :  { %2345 = vmatpush1.bf16.msra.mxu0 %v3746_v23  ;;  %2386 = vmatpush1.bf16.msra.mxu1 %v3747_v24 }
 0x7cd   :  { %2346 = vmatprep.subr.bf16.mxu0 %v3748_v25  ;;  %2387 = vmatprep.subr.bf16.mxu1 %v3750_v26 }
 0x7d0   :  { %2347 = vmatpush1.bf16.msra.mxu0 %v3752_v27  ;;  %2388 = vmatpush1.bf16.msra.mxu1 %v3753_v28 }
 0x7d1   :  { %2348 = vmatprep.subr.bf16.mxu0 %v3754_v29  ;;  %2389 = vmatprep.subr.bf16.mxu1 %v3756_v30 }
 0x7d4   :  { %2349 = vmatpush1.bf16.msra.mxu0 %v3758_v31  ;;  %2390 = vmatpush1.bf16.msra.mxu1 %v3759_v32 }
 0x7d5   :  { %2350 = vmatprep.subr.bf16.mxu0 %v3760_v33  ;;  %2391 = vmatprep.subr.bf16.mxu1 %v3762_v34 }
 0x7d8   :  { %2351 = vmatpush1.bf16.msra.mxu0 %v3764_v35  ;;  %2392 = vmatpush1.bf16.msra.mxu1 %v3765_v36 }
 0x7db   :  { %2369 = vmatmul.mubr.bf16.vlgmr.msra.gmra.mxu0 %v2143_v37  ;;  %2410 = vmatmul.mubr.bf16.vlgmr.msra.gmra.mxu1 %v2143_v37 }
 0x89b   :  { %v2370_v38 = vpop.f32.mrf.mxu0  ;;  %v2411_v39 = vpop.f32.mrf.mxu1 }
 0x89d   :  { %v2372_v41 = vpop.f32.mrf.mxu0  ;;  %v2413_v42 = vpop.f32.mrf.mxu1 }
 0x89e   :  { %v2422_v43 = vcombine.low %v2370_v38, %v2372_v41  ;;  %v2423_v44 = vcombine.low %v2411_v39, %v2413_v42 }
 0x89f   :  { %v2374_v45 = vpop.f32.mrf.mxu0  ;;  %v2415_v46 = vpop.f32.mrf.mxu1 }
 0x8a0   :  { %v2430_v47 = vrot.slane %v2422_v43, %v4332_v40  ;;  %v2437_v48 = vrot.slane %v2423_v44, %v4332_v40 }
 0x8a1   :  { %v2375_v49 = vpop.f32.mrf.mxu0  ;;  %v2416_v50 = vpop.f32.mrf.mxu1 }
 0x8a2   :  { %v2438_v51 = vcombine.low %v2430_v47, %v2437_v48 }
 0x8a4   :  { %v2445_v53 = vrot.slane %v2438_v51, %v4332_v40 }
 0x8a6   :  { %v2447_v54 = vadd.f32 %v2445_v53, %v2142_v52 }
 0x8a8   :  { %v3280_v55 = vmul.f32 -1.442695, %v2447_v54  ;;  %v2455_v58 = vrot.slane %v2447_v54, 2 }
 0x8aa   :  { %3766 = vpow2.f32 %v3280_v55 }
 0x8b7   :  { %v3767_v56 = vpop.eup %3766 }
 0x8b8   :  { %v2451_v57 = vadd.f32 1.0, %v3767_v56 }
 0x8ba   :  { %3768 = vrcp.f32 %v2451_v57 }
 0x8bb   :  { %3770 = vtanh.f32 %v2455_v58 }
 0x8c7   :  { %v3769_v59 = vpop.eup %3768 }
 0x8c8   :  { %v2459_v60 = vrot.slane %v3769_v59, 1  ;;  %v3771_v61 = vpop.eup %3770  ;;  %v2465_v1 = vrot.slane %v3769_v59, 3 }
 0x8c9   :  { %v2462_v63 = vmul.f32 %v3771_v61, %v3769_v59 }
 0x8ca   :  { %v2461_v62 = vmul.f32 %v2459_v60, %v4407_v6 }
 0x8cc   :  { %v4421_v7 = vadd.f32 %v2462_v63, %v2461_v62 }
 0x8ce   :  { %3772 = vtanh.f32 %v4421_v7 }
 0x8db   :  { %v3773_v2 = vpop.eup %3772 }
 0x8dc   :  { %v4424_v3 = vmul.f32 %v3773_v2, %v2465_v1 }
 0x8de   :  { %2468 = vst [vmem:[#allocation4 + $0x6] sm:$0x1] %v4424_v3 }
 0x8df   :  { %4106 = dma.done.wait [#allocation3 + $0x7], 64 }
 0x8e0   :  { %4107 = vsyncadd [#allocation3 + $0x7], 4294967232  ;;  %2698 = vmatprep.mubr.bf16.mxu0 %v4127_v0  ;;  %2739 = vmatprep.mubr.bf16.mxu1 %v4127_v0  ;;  %v3774_v4 = vld [vmem:[#allocation7 + $0xe4] ss:$16 sps:$4 sm:$0xff]   ;;  %v3776_v5 = vld [vmem:[#allocation7 + $0xec] ss:$16 sps:$4 sm:$0xff]   ;;  %v2473_v36 = vpack.c.bf16 %v4424_v3, %v4424_v3 }
 0x8e1   :  { %2666 = vmatprep.subr.bf16.mxu0 %v3774_v4  ;;  %v3778_v6 = vld [vmem:[#allocation7 + $0xe0] ss:$16 sps:$4 sm:$0xff]   ;;  %v3779_v8 = vld [vmem:[#allocation7 + $0xe8] ss:$16 sps:$4 sm:$0xff]   ;;  %2707 = vmatprep.subr.bf16.mxu1 %v3776_v5  ;;  %v3780_v9 = vld [vmem:[#allocation7 + $0xc4] ss:$16 sps:$4 sm:$0xff]  }
 0x8e2   :  { %2667 = vmatpush1.bf16.msra.mxu0 %v3778_v6  ;;  %2708 = vmatpush1.bf16.msra.mxu1 %v3779_v8  ;;  %v3782_v10 = vld [vmem:[#allocation7 + $0xcc] ss:$16 sps:$4 sm:$0xff]   ;;  %v3784_v11 = vld [vmem:[#allocation7 + $0xc0] ss:$16 sps:$4 sm:$0xff]   ;;  %v3785_v12 = vld [vmem:[#allocation7 + $0xc8] ss:$16 sps:$4 sm:$0xff]  }
 0x8e3   :  { %2668 = vmatprep.subr.bf16.mxu0 %v3780_v9  ;;  %2709 = vmatprep.subr.bf16.mxu1 %v3782_v10  ;;  %v3786_v13 = vld [vmem:[#allocation7 + $0xa4] ss:$16 sps:$4 sm:$0xff]   ;;  %v3788_v14 = vld [vmem:[#allocation7 + $0xac] ss:$16 sps:$4 sm:$0xff]   ;;  %v3790_v15 = vld [vmem:[#allocation7 + $0xa0] ss:$16 sps:$4 sm:$0xff]  }
 0x8e4   :  { %v3791_v16 = vld [vmem:[#allocation7 + $0xa8] ss:$16 sps:$4 sm:$0xff]   ;;  %v3792_v0 = vld [vmem:[#allocation7 + $0x84] ss:$16 sps:$4 sm:$0xff]   ;;  %v3794_v17 = vld [vmem:[#allocation7 + $0x8c] ss:$16 sps:$4 sm:$0xff]  }
 0x8e5   :  { %v3796_v18 = vld [vmem:[#allocation7 + $0x80] ss:$16 sps:$4 sm:$0xff]   ;;  %v3797_v19 = vld [vmem:[#allocation7 + $0x88] ss:$16 sps:$4 sm:$0xff]   ;;  %v3798_v20 = vld [vmem:[#allocation7 + $0x64] ss:$16 sps:$4 sm:$0xff]  }
 0x8e6   :  { %2669 = vmatpush1.bf16.msra.mxu0 %v3784_v11  ;;  %2710 = vmatpush1.bf16.msra.mxu1 %v3785_v12  ;;  %v3800_v21 = vld [vmem:[#allocation7 + $0x6c] ss:$16 sps:$4 sm:$0xff]   ;;  %v3802_v22 = vld [vmem:[#allocation7 + $0x60] ss:$16 sps:$4 sm:$0xff]   ;;  %v3803_v23 = vld [vmem:[#allocation7 + $0x68] ss:$16 sps:$4 sm:$0xff]  }
 0x8e7   :  { %2670 = vmatprep.subr.bf16.mxu0 %v3786_v13  ;;  %2711 = vmatprep.subr.bf16.mxu1 %v3788_v14  ;;  %v3804_v24 = vld [vmem:[#allocation7 + $0x44] ss:$16 sps:$4 sm:$0xff]   ;;  %v3806_v25 = vld [vmem:[#allocation7 + $0x4c] ss:$16 sps:$4 sm:$0xff]   ;;  %v3808_v26 = vld [vmem:[#allocation7 + $0x40] ss:$16 sps:$4 sm:$0xff]  }
 0x8e8   :  { %v3809_v27 = vld [vmem:[#allocation7 + $0x48] ss:$16 sps:$4 sm:$0xff]   ;;  %v3810_v28 = vld [vmem:[#allocation7 + $0x24] ss:$16 sps:$4 sm:$0xff]   ;;  %v3812_v29 = vld [vmem:[#allocation7 + $0x2c] ss:$16 sps:$4 sm:$0xff]  }
 0x8e9   :  { %v3814_v30 = vld [vmem:[#allocation7 + $0x20] ss:$16 sps:$4 sm:$0xff]   ;;  %v3815_v31 = vld [vmem:[#allocation7 + $0x28] ss:$16 sps:$4 sm:$0xff]   ;;  %v3816_v32 = vld [vmem:[#allocation7 + $0x4] ss:$16 sps:$4 sm:$0xff]  }
 0x8ea   :  { %2671 = vmatpush1.bf16.msra.mxu0 %v3790_v15  ;;  %2712 = vmatpush1.bf16.msra.mxu1 %v3791_v16  ;;  %v3818_v33 = vld [vmem:[#allocation7 + $0xc] ss:$16 sps:$4 sm:$0xff]   ;;  %v3820_v34 = vld [vmem:[#allocation7] ss:$16 sps:$4 sm:$0xff]   ;;  %v3821_v35 = vld [vmem:[#allocation7 + $0x8] ss:$16 sps:$4 sm:$0xff]  }
 0x8eb   :  { %2672 = vmatprep.subr.bf16.mxu0 %v3792_v0  ;;  %2713 = vmatprep.subr.bf16.mxu1 %v3794_v17  ;;  %v3822_v37 = vld [vmem:[#allocation10 + $0x38] sm:$0xff]   ;;  %v4129_v38 = vmov 0.0   ;;  %v3823_v39 = vld [vmem:[#allocation10 + $0x30] sm:$0xff]   ;;  %v3824_v41 = vld [vmem:[#allocation10 + $0x28] sm:$0xff]   ;;  %vm4130_vm0 = vmmov 0   ;;  %s4131_s30 = smov [#allocation12]  }
 0x8ec   :  { %v3825_v42 = vld [vmem:[#allocation10 + $0x20] sm:$0xff]   ;;  %v3826_v43 = vld [vmem:[#allocation10 + $0x18] sm:$0xff]   ;;  %v3827_v44 = vld [vmem:[#allocation10 + $0x10] sm:$0xff]   ;;  %s2930_s2 = sshll.u32 %s4131_s30, 4  ;;  %s2931_s2 = int_to_ptr.vmem [resolvable:$true] %s2930_s2 }
 0x8ed   :  { %v3828_v45 = vld [vmem:[#allocation10 + $0x8] sm:$0xff]   ;;  %v3829_v46 = vld [vmem:[#allocation10] sm:$0xff]   ;;  %v3314_v15 = vld [vmem:[%s4445_s4] ss:$0 sm:$0xff]  ;;  %s4066_s4 = scalar_lea.vmem %s2931_s2, 128  ;;  %p4071_p7 = scmp.lt.s32.totalorder %s2931_s2, %s2931_s2 }
 0x8ee   :  { %2673 = vmatpush1.bf16.msra.mxu0 %v3796_v18  ;;  %2714 = vmatpush1.bf16.msra.mxu1 %v3797_v19  ;;  %v2472_v60 = vld [vmem:[#allocation2 + $0x7] ss:$8 sm:$0xf]  ;;  %p4067_p6 = scmp.ne.s32.totalorder %s2931_s2, %s4066_s4  ;;  %p4072_p8 = scmp.lt.s32.totalorder %s4066_s4, %s4066_s4 }
 0x8ef   :  { %2674 = vmatprep.subr.bf16.mxu0 %v3798_v20  ;;  %2715 = vmatprep.subr.bf16.mxu1 %v3800_v21 }
 0x8f0   :  { %p4073_p9 = por %p4072_p8, %p4071_p7 }
 0x8f2   :  { %2675 = vmatpush1.bf16.msra.mxu0 %v3802_v22  ;;  %2716 = vmatpush1.bf16.msra.mxu1 %v3803_v23  ;;  %p4074_p10 = pnand %p4073_p9, %p4067_p6 }
 0x8f3   :  { %2676 = vmatprep.subr.bf16.mxu0 %v3804_v24  ;;  %2717 = vmatprep.subr.bf16.mxu1 %v3806_v25 }
 0x8f6   :  { %2677 = vmatpush1.bf16.msra.mxu0 %v3808_v26  ;;  %2718 = vmatpush1.bf16.msra.mxu1 %v3809_v27 }
 0x8f7   :  { %2678 = vmatprep.subr.bf16.mxu0 %v3810_v28  ;;  %2719 = vmatprep.subr.bf16.mxu1 %v3812_v29 }
 0x8fa   :  { %2679 = vmatpush1.bf16.msra.mxu0 %v3814_v30  ;;  %2720 = vmatpush1.bf16.msra.mxu1 %v3815_v31 }
 0x8fb   :  { %2680 = vmatprep.subr.bf16.mxu0 %v3816_v32  ;;  %2721 = vmatprep.subr.bf16.mxu1 %v3818_v33 }
 0x8fe   :  { %2681 = vmatpush1.bf16.msra.mxu0 %v3820_v34  ;;  %2722 = vmatpush1.bf16.msra.mxu1 %v3821_v35 }
 0x8ff   :  { %3340 = vmatprep.subr.bf16.mxu0 %v4129_v38 }
 0x901   :  { %2699 = vmatmul.mubr.bf16.vlgmr.msra.gmra.mxu0 %v2473_v36  ;;  %2740 = vmatmul.mubr.bf16.vlgmr.msra.gmra.mxu1 %v2473_v36 }
 0x902   :  { %3341 = vmatpush3.bf16.msra.mxu0 %v3822_v37  ;;  %3356 = vmatprep.mubr.msk.bf16.mxu0 %vm4130_vm0, %v4129_v38 }
 0x903   :  { %3342 = vmatprep.subr.bf16.mxu0 %v4129_v38 }
 0x906   :  { %3343 = vmatpush3.bf16.msra.mxu0 %v3823_v39 }
 0x907   :  { %3344 = vmatprep.subr.bf16.mxu0 %v4129_v38 }
 0x90a   :  { %3345 = vmatpush3.bf16.msra.mxu0 %v3824_v41 }
 0x90b   :  { %3346 = vmatprep.subr.bf16.mxu0 %v4129_v38 }
 0x90e   :  { %3347 = vmatpush3.bf16.msra.mxu0 %v3825_v42 }
 0x90f   :  { %3348 = vmatprep.subr.bf16.mxu0 %v4129_v38 }
 0x912   :  { %3349 = vmatpush3.bf16.msra.mxu0 %v3826_v43 }
 0x913   :  { %3350 = vmatprep.subr.bf16.mxu0 %v4129_v38 }
 0x916   :  { %3351 = vmatpush3.bf16.msra.mxu0 %v3827_v44 }
 0x917   :  { %3352 = vmatprep.subr.bf16.mxu0 %v4129_v38 }
 0x91a   :  { %3353 = vmatpush3.bf16.msra.mxu0 %v3828_v45 }
 0x91b   :  { %3354 = vmatprep.subr.bf16.mxu0 %v4129_v38 }
 0x91e   :  { %3355 = vmatpush3.bf16.msra.mxu0 %v3829_v46 }
 0x9c1   :  { %v2700_v47 = vpop.f32.mrf.mxu0  ;;  %v2741_v48 = vpop.f32.mrf.mxu1 }
 0x9c3   :  { %v2702_v49 = vpop.f32.mrf.mxu0  ;;  %v2743_v50 = vpop.f32.mrf.mxu1 }
 0x9c4   :  { %v2752_v51 = vcombine.low %v2700_v47, %v2702_v49  ;;  %v2753_v52 = vcombine.low %v2741_v48, %v2743_v50 }
 0x9c5   :  { %v2704_v53 = vpop.f32.mrf.mxu0  ;;  %v2745_v54 = vpop.f32.mrf.mxu1 }
 0x9c6   :  { %v2760_v55 = vrot.slane %v2752_v51, %v4332_v40  ;;  %v2767_v56 = vrot.slane %v2753_v52, %v4332_v40 }
 0x9c7   :  { %v2705_v57 = vpop.f32.mrf.mxu0  ;;  %v2746_v58 = vpop.f32.mrf.mxu1 }
 0x9c8   :  { %v2768_v59 = vcombine.low %v2760_v55, %v2767_v56 }
 0x9ca   :  { %v2775_v61 = vrot.slane %v2768_v59, %v4332_v40 }
 0x9cc   :  { %v2777_v62 = vadd.f32 %v2775_v61, %v2472_v60 }
 0x9ce   :  { %v3313_v63 = vmul.f32 -1.442695, %v2777_v62  ;;  %v2785_v3 = vrot.slane %v2777_v62, 2 }
 0x9d0   :  { %3830 = vpow2.f32 %v3313_v63 }
 0x9dd   :  { %v3831_v1 = vpop.eup %3830 }
 0x9de   :  { %v2781_v2 = vadd.f32 1.0, %v3831_v1 }
 0x9e0   :  { %3832 = vrcp.f32 %v2781_v2 }
 0x9e1   :  { %3834 = vtanh.f32 %v2785_v3 }
 0x9ed   :  { %v3833_v4 = vpop.eup %3832 }
 0x9ee   :  { %v2789_v5 = vrot.slane %v3833_v4, 1  ;;  %v3835_v6 = vpop.eup %3834  ;;  %v2795_v11 = vrot.slane %v3833_v4, 3 }
 0x9ef   :  { %v2792_v9 = vmul.f32 %v3835_v6, %v3833_v4 }
 0x9f0   :  { %v2791_v8 = vmul.f32 %v2789_v5, %v4421_v7 }
 0x9f2   :  { %v2793_v10 = vadd.f32 %v2792_v9, %v2791_v8 }
 0x9f4   :  { %3836 = vtanh.f32 %v2793_v10 }
 0xa01   :  { %v3837_v12 = vpop.eup %3836 }
 0xa02   :  { %v2797_v13 = vmul.f32 %v3837_v12, %v2795_v11 }
 0xa04   :  { %2798 = vst [vmem:[#allocation4 + $0x7] sm:$0x1] %v2797_v13 }
 0xa0b   :  { %v2799_v40 = vld [vmem:[#allocation4] sm:$0xff] }
 0xa0c   :  { %v2800_v14 = vpack.c.bf16 %v2799_v40, %v2799_v40 }
 0xa0e   :  { %3357 = vmatmul.mubr.bf16.vlgmr.msra.gmra.mxu0 %v2800_v14 }
 0xace   :  { %v2906_v16 = vpop.f32.mrf.mxu0 }
 0xacf   :  { %v2907_v0 = vadd.f32 %v3314_v15, %v2906_v16 }
 0xad0   :  { %v3358_v17 = vpop.f32.mrf.mxu0 }
 0xad1   :  { %2912 = vmax.xlane.f32.xlu0 %v2907_v0 }
 0xad2   :  { %v2909_v18 = vpop.f32.mrf.mxu0 }
 0xad4   :  { %v3359_v7 = vpop.f32.mrf.mxu0 }
 0xb5a   :  { %v2913_v19 = vpop.xlane.xlu0 %2912 }
 0xb5b   :  { %v2914_v20 = vsub.f32 %v2907_v0, %v2913_v19 }
 0xb5d   :  { %v2915_v21 = vmul.f32 1.442695, %v2914_v20 }
 0xb5f   :  { %3838 = vpow2.f32 %v2915_v21 }
 0xb6c   :  { %v3839_v22 = vpop.eup %3838 }
 0xb6d   :  { %2917 = vadd.xlane.f32.xlu0 %v3839_v22 }
 0xbf6   :  { %v2918_v23 = vpop.xlane.xlu0 %2917 }
 0xbf7   :  { %3840 = vlog2.f32 %v2918_v23 }
 0xc04   :  { %v3841_v24 = vpop.eup %3840 }
 0xc05   :  { %v2920_v25 = vmul.f32 0.6931472, %v3841_v24 }
 0xc07   :  { %v2921_v26 = vadd.f32 %v2920_v25, %v2913_v19 }
 0xc09   :  { %v2922_v27 = vsub.f32 %v2907_v0, %v2921_v26 }
 0xc0b   :  { %2923 = vst [vmem:[#allocation12] sm:$0xff] %v2922_v27 }
 0xc0c   :  { %4077 = shalt.err (!%p4074_p10)
}
 0xc0d   :  { %2933 = dma.vmem_to_hbm [thread:$0]  %s2931_s2, 128, %s4446_s5, [#allocation9]  }
 0xc0e   :  { %4108 = dma.done.wait [#allocation9], 128  }
 0xc0f   :  { %4109 = vsyncadd [#allocation9], 4294967168 }
 0xc10   :  { %2937 = vsyncpa [#allocation8], 1 }
 0xc11   :  { %2938 = vsyncpa [#allocation11], 1 }
 0xc12   :  { %2939 = vsyncpa [#allocation9], 1 }
 0xc13   :  { %2940 = vsyncmov [#allocation3] }
 0xc16   :  { %s2941_s22 = vpop.sfrf %2940 }
 0xc17   :  { %p3323_p11 = scmp.ne.s32.totalorder %s2941_s22, 0 }
 0xc19   :  { %2945 = shalt.err (%p3323_p11)  }
 0xc1a   :  { %2947 = vsyncmov [#allocation3 + $0x1] }
 0xc1d   :  { %s2948_s24 = vpop.sfrf %2947 }
 0xc1e   :  { %p3324_p12 = scmp.ne.s32.totalorder %s2948_s24, 0 }
 0xc20   :  { %2952 = shalt.err (%p3324_p12)  }
 0xc21   :  { %2954 = vsyncmov [#allocation3 + $0x2] }
 0xc24   :  { %s2955_s25 = vpop.sfrf %2954 }
 0xc25   :  { %p3325_p13 = scmp.ne.s32.totalorder %s2955_s25, 0 }
 0xc27   :  { %2959 = shalt.err (%p3325_p13)  }
 0xc28   :  { %2961 = vsyncmov [#allocation3 + $0x3] }
 0xc2b   :  { %s2962_s27 = vpop.sfrf %2961 }
 0xc2c   :  { %p3326_p0 = scmp.ne.s32.totalorder %s2962_s27, 0 }
 0xc2e   :  { %2966 = shalt.err (%p3326_p0)  }
 0xc2f   :  { %2968 = vsyncmov [#allocation3 + $0x4] }
 0xc32   :  { %s2969_s5 = vpop.sfrf %2968 }
 0xc33   :  { %p3327_p1 = scmp.ne.s32.totalorder %s2969_s5, 0 }
 0xc35   :  { %2973 = shalt.err (%p3327_p1)  }
 0xc36   :  { %2975 = vsyncmov [#allocation3 + $0x5] }
 0xc39   :  { %s2976_s14 = vpop.sfrf %2975 }
 0xc3a   :  { %p3328_p2 = scmp.ne.s32.totalorder %s2976_s14, 0 }
 0xc3c   :  { %2980 = shalt.err (%p3328_p2)  }
 0xc3d   :  { %2982 = vsyncmov [#allocation3 + $0x6] }
 0xc40   :  { %s2983_s15 = vpop.sfrf %2982 }
 0xc41   :  { %p3329_p3 = scmp.ne.s32.totalorder %s2983_s15, 0 }
 0xc43   :  { %2987 = shalt.err (%p3329_p3)  }
 0xc44   :  { %2989 = vsyncmov [#allocation3 + $0x7] }
 0xc47   :  { %s2990_s26 = vpop.sfrf %2989 }
 0xc48   :  { %p3330_p4 = scmp.ne.s32.totalorder %s2990_s26, 0 }
 0xc4a   :  { %2994 = shalt.err (%p3330_p4)  }

</bundles_post_ra>
